<compile_context>
chip_gen: v7x
topology: tpu7x:2x2x1
jax: 0.10.0
libtpu: 0.0.40
codegen_flags: <defaults>
</compile_context>

<pallas_src>
import jax
import jax.numpy as jnp
from jax.experimental import pallas as pl
from jax.experimental.pallas import tpu as pltpu


def conv_relu_kernel(x_ref, w_ref, b_ref, o_ref, xpad_ref, patch_ref):
    # x_ref:     (Cin, H, W)          one batch element, NCHW (batch squeezed)
    # w_ref:     (Cout, 9*Cin)        folded HWIO weights, K = tap*Cin + cin
    # b_ref:     (Cout, 1)            bias column
    # o_ref:     (Cout, H*W)          lane-dense output (spatial on lanes)
    # xpad_ref:  (Cin, H+2, W+2)      VMEM scratch, zero-padded input
    # patch_ref: (9*Cin, H, W)        VMEM scratch, im2col patch
    cin, H, W = x_ref.shape

    # In-kernel zero padding (padding=1): no wrapper-side pad / extra HBM pass.
    # Re-zeroed every step so it is megacore-safe (scratch is per-core).
    xpad_ref[...] = jnp.zeros_like(xpad_ref)
    xpad_ref[:, 1:H + 1, 1:W + 1] = x_ref[...]

    # im2col once into VMEM scratch: row-block t = kh*3 + kw holds the
    # (kh, kw)-shifted window for all input channels.  Pure strided copies,
    # no per-tap reshape.
    for kh in range(3):
        for kw in range(3):
            t = kh * 3 + kw
            patch_ref[t * cin:(t + 1) * cin, :, :] = \
                xpad_ref[:, kh:kh + H, kw:kw + W]

    # Single MXU matmul: (Cout, 9*Cin) x (9*Cin, H*W) -> (Cout, H*W), f32 acc.
    patch = patch_ref[...].reshape(9 * cin, H * W)
    acc = jnp.dot(w_ref[...], patch, preferred_element_type=jnp.float32)

    acc = acc + b_ref[...]          # bias, broadcast along lanes
    acc = jnp.maximum(acc, 0.0)     # ReLU
    o_ref[...] = acc.astype(o_ref.dtype)


def conv_relu(x_nchw, weight_oihw, bias):
    """ConvReLU forward. x: (N, Cin, H, W) f32; weight: (Cout, Cin, 3, 3); bias: (Cout,)."""
    N, Cin, H, W = x_nchw.shape
    Cout, _, KH, KW = weight_oihw.shape

    # Fold weights to (Cout, 9*Cin) with K-ordering (kh, kw, cin) matching the
    # im2col patch built in the kernel.  Tiny tensor -> negligible cost.
    w_mat = jnp.transpose(weight_oihw, (0, 2, 3, 1)).reshape(Cout, KH * KW * Cin)
    b_col = bias.reshape(Cout, 1)

    out_flat = pl.pallas_call(
        conv_relu_kernel,
        out_shape=jax.ShapeDtypeStruct((N, Cout, H * W), x_nchw.dtype),
        grid=(N,),
        in_specs=[
            pl.BlockSpec((None, Cin, H, W), lambda n: (n, 0, 0, 0)),
            pl.BlockSpec((Cout, KH * KW * Cin), lambda n: (0, 0)),
            pl.BlockSpec((Cout, 1), lambda n: (0, 0)),
        ],
        out_specs=pl.BlockSpec((None, Cout, H * W), lambda n: (n, 0, 0)),
        scratch_shapes=[
            pltpu.VMEM((Cin, H + 2, W + 2), x_nchw.dtype),
            pltpu.VMEM((KH * KW * Cin, H, W), x_nchw.dtype),
        ],
        compiler_params=pltpu.CompilerParams(
            dimension_semantics=("parallel",)),
    )(x_nchw, w_mat, b_col)

    # Contiguous reshape (free; no transpose, no extra HBM pass) -> NCHW.
    return out_flat.reshape(N, Cout, H, W)


def conv_relu_reference(x_nchw, weight_oihw, bias):
    """Pure-JAX reference (matches torch Conv2d(k=3, pad=1) + ReLU)."""
    y = jax.lax.conv_general_dilated(
        x_nchw, weight_oihw,
        window_strides=(1, 1), padding=((1, 1), (1, 1)),
        dimension_numbers=("NCHW", "OIHW", "NCHW"))
    y = y + bias.reshape(1, -1, 1, 1)
    return jnp.maximum(y, 0.0)


if __name__ == "__main__":
    # Small deterministic problem: batch=2, inch=4, outch=8, spatial=16x16.
    N, Cin, Cout, H, W = 2, 4, 8, 16, 16
    key = jax.random.PRNGKey(0)
    kx, kw, kb = jax.random.split(key, 3)

    x = jax.random.normal(kx, (N, Cin, H, W), dtype=jnp.float32)
    weight = jax.random.normal(kw, (Cout, Cin, 3, 3), dtype=jnp.float32) * 0.1
    bias = jax.random.normal(kb, (Cout,), dtype=jnp.float32) * 0.1

    out = jax.block_until_ready(conv_relu(x, weight, bias))
    ref = jax.block_until_ready(conv_relu_reference(x, weight, bias))

    assert out.shape == (N, Cout, H, W), out.shape
    assert jnp.allclose(out, ref, rtol=1e-4, atol=1e-4), \
        float(jnp.max(jnp.abs(out - ref)))

    print("KERNEL_OK")
</pallas_src>

<mosaic_0001>
module attributes {stable_mosaic.version = 11 : i64} {
  func.func @conv_relu_kernel(%arg0: i32, %arg1: memref<1x4x16x16xf32, #tpu.memory_space<vmem>>, %arg2: memref<8x36xf32, #tpu.memory_space<vmem>>, %arg3: memref<8x1xf32, #tpu.memory_space<vmem>>, %arg4: memref<1x8x256xf32, #tpu.memory_space<vmem>>, %arg5: memref<4x18x18xf32, #tpu.memory_space<vmem>>, %arg6: memref<36x16x16xf32, #tpu.memory_space<vmem>>) attributes {dimension_semantics = [#tpu.dimension_semantics<parallel>], iteration_bounds = array<i64: 2>, scalar_prefetch = 0 : i64, scratch_operands = 2 : i64, tpu.core_type = #tpu.core_type<tc>, window_params = [{transform_indices = @transform_0, window_bounds = array<i64: 1, 4, 16, 16>}, {pipeline_mode = #tpu.pipeline_mode<synchronous>, transform_indices = @transform_1, window_bounds = array<i64: 8, 36>}, {pipeline_mode = #tpu.pipeline_mode<synchronous>, transform_indices = @transform_2, window_bounds = array<i64: 8, 1>}, {transform_indices = @transform_3, window_bounds = array<i64: 1, 8, 256>}]} {
    %cst = arith.constant 0.000000e+00 : f32
    %0 = vector.broadcast %cst : f32 to vector<4x18x18xf32>
    %c0 = arith.constant 0 : index
    %c0_0 = arith.constant 0 : index
    %c0_1 = arith.constant 0 : index
    %1 = vector.load %arg5[%c0, %c0_0, %c0_1] : memref<4x18x18xf32, #tpu.memory_space<vmem>>, vector<4x18x18xf32>
    tpu.vector_store %arg5[%c0, %c0_0, %c0_1], %0 {strides = array<i32>} : memref<4x18x18xf32, #tpu.memory_space<vmem>>, vector<4x18x18xf32>,
    %c0_2 = arith.constant 0 : index
    %c0_3 = arith.constant 0 : index
    %c0_4 = arith.constant 0 : index
    %c0_5 = arith.constant 0 : index
    %2 = vector.load %arg1[%c0_2, %c0_3, %c0_4, %c0_5] : memref<1x4x16x16xf32, #tpu.memory_space<vmem>>, vector<1x4x16x16xf32>
    %3 = vector.shape_cast %2 : vector<1x4x16x16xf32> to vector<4x16x16xf32>
    %c0_6 = arith.constant 0 : index
    %c1 = arith.constant 1 : index
    %c1_7 = arith.constant 1 : index
    %4 = vector.load %arg5[%c0_6, %c1, %c1_7] : memref<4x18x18xf32, #tpu.memory_space<vmem>>, vector<4x16x16xf32>
    tpu.vector_store %arg5[%c0_6, %c1, %c1_7], %3 {strides = array<i32>} : memref<4x18x18xf32, #tpu.memory_space<vmem>>, vector<4x16x16xf32>,
    %c0_8 = arith.constant 0 : index
    %c0_9 = arith.constant 0 : index
    %c0_10 = arith.constant 0 : index
    %5 = vector.load %arg5[%c0_8, %c0_9, %c0_10] : memref<4x18x18xf32, #tpu.memory_space<vmem>>, vector<4x16x16xf32>
    %c0_11 = arith.constant 0 : index
    %c0_12 = arith.constant 0 : index
    %c0_13 = arith.constant 0 : index
    %6 = vector.load %arg6[%c0_11, %c0_12, %c0_13] : memref<36x16x16xf32, #tpu.memory_space<vmem>>, vector<4x16x16xf32>
    tpu.vector_store %arg6[%c0_11, %c0_12, %c0_13], %5 {strides = array<i32>} : memref<36x16x16xf32, #tpu.memory_space<vmem>>, vector<4x16x16xf32>,
    %c0_14 = arith.constant 0 : index
    %c0_15 = arith.constant 0 : index
    %c1_16 = arith.constant 1 : index
    %7 = vector.load %arg5[%c0_14, %c0_15, %c1_16] : memref<4x18x18xf32, #tpu.memory_space<vmem>>, vector<4x16x16xf32>
    %c4 = arith.constant 4 : index
    %c0_17 = arith.constant 0 : index
    %c0_18 = arith.constant 0 : index
    %8 = vector.load %arg6[%c4, %c0_17, %c0_18] : memref<36x16x16xf32, #tpu.memory_space<vmem>>, vector<4x16x16xf32>
    tpu.vector_store %arg6[%c4, %c0_17, %c0_18], %7 {strides = array<i32>} : memref<36x16x16xf32, #tpu.memory_space<vmem>>, vector<4x16x16xf32>,
    %c0_19 = arith.constant 0 : index
    %c0_20 = arith.constant 0 : index
    %c2 = arith.constant 2 : index
    %9 = vector.load %arg5[%c0_19, %c0_20, %c2] : memref<4x18x18xf32, #tpu.memory_space<vmem>>, vector<4x16x16xf32>
    %c8 = arith.constant 8 : index
    %c0_21 = arith.constant 0 : index
    %c0_22 = arith.constant 0 : index
    %10 = vector.load %arg6[%c8, %c0_21, %c0_22] : memref<36x16x16xf32, #tpu.memory_space<vmem>>, vector<4x16x16xf32>
    tpu.vector_store %arg6[%c8, %c0_21, %c0_22], %9 {strides = array<i32>} : memref<36x16x16xf32, #tpu.memory_space<vmem>>, vector<4x16x16xf32>,
    %c0_23 = arith.constant 0 : index
    %c1_24 = arith.constant 1 : index
    %c0_25 = arith.constant 0 : index
    %11 = vector.load %arg5[%c0_23, %c1_24, %c0_25] : memref<4x18x18xf32, #tpu.memory_space<vmem>>, vector<4x16x16xf32>
    %c12 = arith.constant 12 : index
    %c0_26 = arith.constant 0 : index
    %c0_27 = arith.constant 0 : index
    %12 = vector.load %arg6[%c12, %c0_26, %c0_27] : memref<36x16x16xf32, #tpu.memory_space<vmem>>, vector<4x16x16xf32>
    tpu.vector_store %arg6[%c12, %c0_26, %c0_27], %11 {strides = array<i32>} : memref<36x16x16xf32, #tpu.memory_space<vmem>>, vector<4x16x16xf32>,
    %c0_28 = arith.constant 0 : index
    %c1_29 = arith.constant 1 : index
    %c1_30 = arith.constant 1 : index
    %13 = vector.load %arg5[%c0_28, %c1_29, %c1_30] : memref<4x18x18xf32, #tpu.memory_space<vmem>>, vector<4x16x16xf32>
    %c16 = arith.constant 16 : index
    %c0_31 = arith.constant 0 : index
    %c0_32 = arith.constant 0 : index
    %14 = vector.load %arg6[%c16, %c0_31, %c0_32] : memref<36x16x16xf32, #tpu.memory_space<vmem>>, vector<4x16x16xf32>
    tpu.vector_store %arg6[%c16, %c0_31, %c0_32], %13 {strides = array<i32>} : memref<36x16x16xf32, #tpu.memory_space<vmem>>, vector<4x16x16xf32>,
    %c0_33 = arith.constant 0 : index
    %c1_34 = arith.constant 1 : index
    %c2_35 = arith.constant 2 : index
    %15 = vector.load %arg5[%c0_33, %c1_34, %c2_35] : memref<4x18x18xf32, #tpu.memory_space<vmem>>, vector<4x16x16xf32>
    %c20 = arith.constant 20 : index
    %c0_36 = arith.constant 0 : index
    %c0_37 = arith.constant 0 : index
    %16 = vector.load %arg6[%c20, %c0_36, %c0_37] : memref<36x16x16xf32, #tpu.memory_space<vmem>>, vector<4x16x16xf32>
    tpu.vector_store %arg6[%c20, %c0_36, %c0_37], %15 {strides = array<i32>} : memref<36x16x16xf32, #tpu.memory_space<vmem>>, vector<4x16x16xf32>,
    %c0_38 = arith.constant 0 : index
    %c2_39 = arith.constant 2 : index
    %c0_40 = arith.constant 0 : index
    %17 = vector.load %arg5[%c0_38, %c2_39, %c0_40] : memref<4x18x18xf32, #tpu.memory_space<vmem>>, vector<4x16x16xf32>
    %c24 = arith.constant 24 : index
    %c0_41 = arith.constant 0 : index
    %c0_42 = arith.constant 0 : index
    %18 = vector.load %arg6[%c24, %c0_41, %c0_42] : memref<36x16x16xf32, #tpu.memory_space<vmem>>, vector<4x16x16xf32>
    tpu.vector_store %arg6[%c24, %c0_41, %c0_42], %17 {strides = array<i32>} : memref<36x16x16xf32, #tpu.memory_space<vmem>>, vector<4x16x16xf32>,
    %c0_43 = arith.constant 0 : index
    %c2_44 = arith.constant 2 : index
    %c1_45 = arith.constant 1 : index
    %19 = vector.load %arg5[%c0_43, %c2_44, %c1_45] : memref<4x18x18xf32, #tpu.memory_space<vmem>>, vector<4x16x16xf32>
    %c28 = arith.constant 28 : index
    %c0_46 = arith.constant 0 : index
    %c0_47 = arith.constant 0 : index
    %20 = vector.load %arg6[%c28, %c0_46, %c0_47] : memref<36x16x16xf32, #tpu.memory_space<vmem>>, vector<4x16x16xf32>
    tpu.vector_store %arg6[%c28, %c0_46, %c0_47], %19 {strides = array<i32>} : memref<36x16x16xf32, #tpu.memory_space<vmem>>, vector<4x16x16xf32>,
    %c0_48 = arith.constant 0 : index
    %c2_49 = arith.constant 2 : index
    %c2_50 = arith.constant 2 : index
    %21 = vector.load %arg5[%c0_48, %c2_49, %c2_50] : memref<4x18x18xf32, #tpu.memory_space<vmem>>, vector<4x16x16xf32>
    %c32 = arith.constant 32 : index
    %c0_51 = arith.constant 0 : index
    %c0_52 = arith.constant 0 : index
    %22 = vector.load %arg6[%c32, %c0_51, %c0_52] : memref<36x16x16xf32, #tpu.memory_space<vmem>>, vector<4x16x16xf32>
    tpu.vector_store %arg6[%c32, %c0_51, %c0_52], %21 {strides = array<i32>} : memref<36x16x16xf32, #tpu.memory_space<vmem>>, vector<4x16x16xf32>,
    %c0_53 = arith.constant 0 : index
    %c0_54 = arith.constant 0 : index
    %c0_55 = arith.constant 0 : index
    %23 = vector.load %arg6[%c0_53, %c0_54, %c0_55] : memref<36x16x16xf32, #tpu.memory_space<vmem>>, vector<36x16x16xf32>
    %24 = vector.shape_cast %23 : vector<36x16x16xf32> to vector<36x256xf32>
    %c0_56 = arith.constant 0 : index
    %c0_57 = arith.constant 0 : index
    %25 = vector.load %arg2[%c0_56, %c0_57] : memref<8x36xf32, #tpu.memory_space<vmem>>, vector<8x36xf32>
    %cst_58 = arith.constant dense<0.000000e+00> : vector<8x256xf32>
    %26 = tpu.matmul %25, %24, %cst_58 {dimension_numbers = #tpu.dot_dimension_numbers<[1], [0], [0], [1], [0, 0, 1, 1], [], []>} : vector<8x36xf32>, vector<36x256xf32>, vector<8x256xf32> -> vector<8x256xf32>
    %c0_59 = arith.constant 0 : index
    %c0_60 = arith.constant 0 : index
    %27 = vector.load %arg3[%c0_59, %c0_60] : memref<8x1xf32, #tpu.memory_space<vmem>>, vector<8x1xf32>
    %28 = vector.broadcast %27 : vector<8x1xf32> to vector<8x256xf32>
    %29 = arith.addf %26, %28 : vector<8x256xf32>
    %cst_61 = arith.constant 0.000000e+00 : f32
    %30 = vector.broadcast %cst_61 : f32 to vector<8x256xf32>
    %31 = arith.maximumf %29, %30 : vector<8x256xf32>
    %c0_62 = arith.constant 0 : index
    %c0_63 = arith.constant 0 : index
    %c0_64 = arith.constant 0 : index
    %32 = vector.load %arg4[%c0_62, %c0_63, %c0_64] : memref<1x8x256xf32, #tpu.memory_space<vmem>>, vector<1x8x256xf32>
    %33 = vector.shape_cast %32 : vector<1x8x256xf32> to vector<8x256xf32>
    %34 = vector.shape_cast %31 : vector<8x256xf32> to vector<1x8x256xf32>
    tpu.vector_store %arg4[%c0_62, %c0_63, %c0_64], %34 {strides = array<i32>} : memref<1x8x256xf32, #tpu.memory_space<vmem>>, vector<1x8x256xf32>,
    return
  }
  func.func @transform_0(%arg0: i32) -> (i32, i32, i32, i32) {
    %c0_i32 = arith.constant 0 : i32
    %c0_i32_0 = arith.constant 0 : i32
    %c0_i32_1 = arith.constant 0 : i32
    %c0_i32_2 = arith.constant 0 : i32
    return %arg0, %c0_i32, %c0_i32_0, %c0_i32_1 : i32, i32, i32, i32
  }
  func.func @transform_1(%arg0: i32) -> (i32, i32) {
    %c0_i32 = arith.constant 0 : i32
    %c0_i32_0 = arith.constant 0 : i32
    %c0_i32_1 = arith.constant 0 : i32
    return %c0_i32, %c0_i32_0 : i32, i32
  }
  func.func @transform_2(%arg0: i32) -> (i32, i32) {
    %c0_i32 = arith.constant 0 : i32
    %c0_i32_0 = arith.constant 0 : i32
    %c0_i32_1 = arith.constant 0 : i32
    return %c0_i32, %c0_i32_0 : i32, i32
  }
  func.func @transform_3(%arg0: i32) -> (i32, i32, i32) {
    %c0_i32 = arith.constant 0 : i32
    %c0_i32_0 = arith.constant 0 : i32
    %c0_i32_1 = arith.constant 0 : i32
    return %arg0, %c0_i32, %c0_i32_0 : i32, i32, i32
  }
}

</mosaic_0001>

<bundles_post_ra>
// kernel: tpu_custom_call.1
= control target key start
LH: loop header
LB: loop body
LE: loop exit
PB: predicated region body
PF: predicated region fallthrough
CT: control target
= control target key end

     0   :  { %8 = vsyncpa [#allocation5], 0  ;;  %s4199_s0 = inlined_call_operand.hbm [shape: f32[2,4,16,16], index: 0, kind: input, shape index: {}]   ;;  %s4200_s1 = inlined_call_operand.vmem [shape: f32[8,36], index: 1, kind: input, shape index: {}]   ;;  %s4201_s2 = inlined_call_operand.vmem [shape: f32[8,1], index: 2, kind: input, shape index: {}]   ;;  %s4202_s3 = inlined_call_operand.hbm [shape: f32[2,8,256], index: 3, kind: output, shape index: {}]  }
   0x1   :  { %10 = vsyncpa [#allocation5 + $0x1], 0 }
   0x2   :  { %11 = vsyncpa [#allocation6], 0 }
   0x3   :  { %13 = vsyncpa [#allocation6 + $0x1], 0  ;;  %s2793_s12 = smov 0   ;;  %s2795_s13 = smov 0  }
   0x4   :  { %s2797_s14 = smov 0   ;;  %s2799_s15 = smov 0  }
   0x5 LB: > { %s2814_s16 = sadd.s32 4294967295, %s2753_s15   ;;  %s2427_s17 = sadd.s32 4294967294, %s2753_s15   ;;  %s2753_s15 = sphi %s2799_s15, %s4439_s15   ;;  %s2749_s14 = sphi %s2797_s14, %s4438_s14   ;;  %s2745_s13 = sphi %s2795_s13, %s4437_s13   ;;  %s2741_s12 = sphi %s2793_s12, %s4436_s12  }
   0x6   : > { %s2818_s18 = sadd.s32 1, %s2753_s15   ;;  %s26_s19 = sadd.s32 1, %s2749_s14 }
   0x7   : > { %s23_s20 = ssub.s32 %s2753_s15, %s2818_s18  ;;  %p33_p0 = scmp.ne.s32.totalorder %s2749_s14, %s2745_s13 }
   0x8   : > { %p24_p1 = scmp.eq.s32.totalorder %s23_s20, 0  ;;  %p34_p2 = scmp.eq.s32.totalorder %s2753_s15, 0 }
   0x9   : > { %p39_p3 = scmp.ne.s32.totalorder %s2745_s13, %s2741_s12  ;;  %p40_p4 = scmp.eq.s32.totalorder %s2814_s16, 0 }
   0xa   : > { %s2830_s21 = scalar_select %p24_p1, %s2749_s14, %s26_s19  }
   0xb   : > { %p2832_p5 = por %p34_p2, %p33_p0  ;;  %p2836_p6 = por %p40_p4, %p39_p3 }
   0xc   : > { %p105_p7 = scmp.eq.s32.totalorder %s2814_s16, 1  ;;  %p111_p8 = scmp.eq.s32.totalorder %s2427_s17, 1 }
   0xd   : > { %p2466_p10 = scmp.lt.s32.totalorder %s2753_s15, 2  ;;  %s137_s26 = sand.u32 1, %s2749_s14  }
   0xe   : > { %p2843_p11 = por %p105_p7, %p33_p0  ;;  %p2847_p12 = por %p111_p8, %p39_p3 }
   0xf   : > { %s2444_s27 = sshll.u32 %s2753_s15, 10  ;;  %s2430_s28 = sshll.u32 %s137_s26, 6 }
  0x10   : > { %s4283_s24 = scalar_select %p2843_p11, 1, 0 }
  0x11   : > { %s4284_s25 = scalar_select %p2847_p12, 1, 0 }
  0x12   : > { %s2856_s4 = scalar_lea.hbm %s4199_s0, %s2444_s27  ;;  %s141_s5 = scalar_lea.vmem [#allocation4], %s2430_s28 }
  0x13   : > { %s148_s6 = sshll.u32 %s141_s5, 4  ;;  %p2860_p13 = pnand %p2466_p10, %p2832_p5  ;;  %s2864_s6 = int_to_ptr.vmem [resolvable:$true] %s148_s6 }
  0x14   : > { %s2866_s8 = scalar_lea.sflag [#allocation5], %s137_s26  ;;  %s2657_s9 = scalar_lea.hbm %s2856_s4, 1024 }
  0x15   : > { %p2658_p0 = scmp.ne.s32.totalorder %s2856_s4, %s2657_s9  ;;  %p2659_p1 = pneg %p2860_p13 }
  0x16   : > { %s2662_s17 = scalar_lea.hbm %s4199_s0, 2048  ;;  %p2663_p4 = scmp.lt.u32.totalorder %s2856_s4, %s4199_s0 }
  0x17   : > { %p2660_p2 = pnand %p2659_p1, %p2658_p0  ;;  %p2664_p5 = scmp.lt.u32.totalorder %s2662_s17, %s2657_s9 }
  0x18   : > { %p2666_p8 = scmp.lt.u32.totalorder %s2657_s9, %s2856_s4 }
  0x19   : > { %p2661_p3 = pneg %p2660_p2  ;;  %p2665_p7 = por %p2664_p5, %p2663_p4 }
  0x1b   : > { %p2667_p10 = por %p2666_p8, %p2665_p7 }
  0x1d   : > { %p2668_p9 = pnand %p2667_p10, %p2661_p3 }
  0x1f   : > { %2671 = shalt.err (!%p2668_p9)
}
  0x20   : > { %s2672_s22 = scalar_lea.vmem %s2864_s6, 1024  ;;  %s2755_s26 = smov [#allocation4]  }
  0x21   : > { %p2673_p0 = scmp.ne.s32.totalorder %s2864_s6, %s2672_s22  ;;  %s2677_s27 = sshll.u32 %s2755_s26, 4  ;;  %s2678_s27 = int_to_ptr.vmem [resolvable:$false] %s2677_s27 }
  0x22   : > { %s2679_s28 = scalar_lea.vmem %s2678_s27, 2048  ;;  %p2680_p11 = scmp.lt.s32.totalorder %s2864_s6, %s2678_s27 }
  0x23   : > { %p2675_p2 = pnand %p2673_p0, %p2659_p1  ;;  %p2681_p4 = scmp.lt.s32.totalorder %s2679_s28, %s2672_s22 }
  0x25   : > { %p2676_p12 = pneg %p2675_p2  ;;  %p2682_p5 = por %p2681_p4, %p2680_p11 }
  0x27   : > { %p2683_p7 = pnand %p2682_p5, %p2676_p12 }
  0x29   : > { %2686 = shalt.err (!%p2683_p7)
}
  0x2a   : > { %s2756_s29 = smov 128   ;;  %s2757_s30 = smov 8  }
  0x2b   : > { %2461 = dma.hbm_to_vmem [thread:$0]  (!%p2860_p13), %s2856_s4, 1024, %s2864_s6, %s2866_s8, %s2756_s29, %s2756_s29, %s2757_s30  }
  0x2c   : > { %p2433_p9 = scmp.ge.s32.totalorder %s2753_s15, 1  ;;  %p156_p1 = scmp.lt.s32.totalorder %s2753_s15, 3 }
  0x2e   : > { %p157_p3 = pnand %p2433_p9, %p156_p1 }
  0x30   : > { %160 = sbr.rel (%p157_p3) target bundleno = 848 (0x350), region = 32 }
  0x37   : > { %s2897_s5 = sand.u32 1, %s2745_s13  }
  0x38   : > { %s2434_s9 = sshll.u32 %s2897_s5, 6  ;;  %s163_s10 = scalar_lea.sflag [#allocation5], %s2897_s5 }
  0x39   : > { %s2901_s11 = scalar_lea.vmem [#allocation4], %s2434_s9 }
  0x3a   : > { %2732 = dma.done.wait (%p2836_p6), %s163_s10, 1024  }
  0x3b   : > { %2734 = vsyncadd (%p2836_p6), %s163_s10, 4294966272  ;;  %vm189_vm0 = vcmask 146432   ;;  %v4204_v0 = vmov 0.0   ;;  %vm192_vm1 = vcmask 140288   ;;  %v205_v1 = vld [vmem:[%s2901_s11 + $0x10] sm:$0xff]  ;;  %v203_v2 = vld [vmem:[%s2901_s11] sm:$0xff]  ;;  %v674_v46 = vlaneseq }
  0x3c   : > { %194 = vst.msk [vmem:[#allocation2 + $0x18] sm:$0xff] %vm189_vm0, %v4204_v0  ;;  %195 = vst.msk [vmem:[#allocation2 + $0x20] sm:$0xff] %vm189_vm0, %v4204_v0  ;;  %2331 = vmatprep.mubr.f32.mxu0 %v4204_v0  ;;  %s2759_s23 = smov 1   ;;  %v206_v3 = vld [vmem:[%s2901_s11 + $0x18] sm:$0xff]  ;;  %v204_v4 = vld [vmem:[%s2901_s11 + $0x8] sm:$0xff]  ;;  %vm243_vm2 = vcmask 138248  }
  0x3d   : > { %190 = vst.msk [vmem:[#allocation2] sm:$0xff] %vm189_vm0, %v4204_v0  ;;  %191 = vst.msk [vmem:[#allocation2 + $0x8] sm:$0xff] %vm189_vm0, %v4204_v0  ;;  %223 = vrot.lane.b32.xlu1 %v205_v1, %s2759_s23  ;;  %219 = vrot.lane.b32.xlu0 %v203_v2, %s2759_s23  ;;  %v208_v5 = vld [vmem:[%s2901_s11 + $0x28] sm:$0xff]  ;;  %v207_v6 = vld [vmem:[%s2901_s11 + $0x20] sm:$0xff]  ;;  %vm260_vm3 = vcmask 130048   ;;  %s2760_s4 = smov 127  }
  0x3e   : > { %197 = vst.msk [vmem:[#allocation2 + $0x30] sm:$0xff] %vm189_vm0, %v4204_v0  ;;  %198 = vst.msk [vmem:[#allocation2 + $0x38] sm:$0xff] %vm189_vm0, %v4204_v0  ;;  %v210_v7 = vld [vmem:[%s2901_s11 + $0x38] sm:$0xff]  ;;  %v209_v8 = vld [vmem:[%s2901_s11 + $0x30] sm:$0xff]  ;;  %s2761_s6 = smov 126   ;;  %v675_v51 = vshrl.u32 %v674_v46, 7 }
  0x3f   : > { %200 = vst.msk [vmem:[#allocation2 + $0x48] sm:$0xff] %vm189_vm0, %v4204_v0  ;;  %201 = vst.msk [vmem:[#allocation2 + $0x50] sm:$0xff] %vm189_vm0, %v4204_v0  ;;  %v2762_v44 = vmov 1983009808   ;;  %v2763_v52 = vmov 1934713408  }
  0x40   : > { %196 = vst.msk [vmem:[#allocation2 + $0x28] sm:$0x3] %vm192_vm1, %v4204_v0  ;;  %193 = vst.msk [vmem:[#allocation2 + $0x10] sm:$0x3] %vm192_vm1, %v4204_v0  ;;  %v672_v45 = vunpack.c.l.s4 %v2762_v44  ;;  %v736_v53 = vunpack.c.l.s4 %v2763_v52  ;;  %s2764_s7 = smov 32   ;;  %s2765_s8 = smov 64  }
  0x41   : > { %199 = vst.msk [vmem:[#allocation2 + $0x40] sm:$0x3] %vm192_vm1, %v4204_v0  ;;  %202 = vst.msk [vmem:[#allocation2 + $0x58] sm:$0x3] %vm192_vm1, %v4204_v0  ;;  %225 = vrot.lane.b32.xlu1 %v206_v3, %s2759_s23  ;;  %221 = vrot.lane.b32.xlu0 %v204_v4, %s2759_s23  ;;  %s2766_s17 = smov 96   ;;  %s2767_s19 = smov 16  }
  0x42   : > { %v673_v50 = vunpack.c.0.s8 %v672_v45  ;;  %v737_v63 = vunpack.c.0.s8 %v736_v53  ;;  %s2768_s20 = smov 48   ;;  %s2769_s22 = smov 80   ;;  %vm2178_vm4 = vcmask 261120   ;;  %vm2184_vm5 = vcmask 392192  }
  0x43   : > { %s2770_s26 = smov 112   ;;  %vm2190_vm6 = vcmask 523264   ;;  %vm2196_vm7 = vcmask 654336   ;;  %vm2202_vm8 = vcmask 785408   ;;  %vm2208_vm9 = vcmask 916480   ;;  %s2435_s9 = sshll.u32 %s2897_s5, 4 }
  0x44   : > { %v3077_v61 = vsub.s32 %v673_v50, %v675_v51  ;;  %vm2260_vm10 = vcmask 1043456   ;;  %vm2256_vm11 = vcmask 293888   ;;  %s2445_s10 = sshll.u32 %s2814_s16, 8  ;;  %s188_s11 = scalar_lea.vmem [#allocation7], %s2435_s9 }
  0x45   : > { %229 = vrot.lane.b32.xlu1 %v208_v5, %s2759_s23  ;;  %227 = vrot.lane.b32.xlu0 %v207_v6, %s2759_s23  ;;  %p4433_p11 = scmp.ne.s32.totalorder %s4283_s24, 0  ;;  %s2772_s16 = smov [#allocation7]  }
  0x49   : > { %233 = vrot.lane.b32.xlu1 %v210_v7, %s2759_s23  ;;  %231 = vrot.lane.b32.xlu0 %v209_v8, %s2759_s23  ;;  %s2357_s23 = sshll.u32 %s188_s11, 4  ;;  %s4157_s23 = int_to_ptr.vmem [resolvable:$true] %s2357_s23 }
  0xaf   : > { %v224_v9 = vpop.permute.xlu1 %223  ;;  %v220_v10 = vpop.permute.xlu0 %219 }
  0xb0   : > { %246 = vst.msk [vmem:[#allocation2 + $0x19] sm:$0xff] %vm243_vm2, %v224_v9  ;;  %244 = vst.msk [vmem:[#allocation2 + $0x1] sm:$0xff] %vm243_vm2, %v220_v10 }
  0xb3   : > { %v226_v11 = vpop.permute.xlu1 %225  ;;  %v222_v12 = vpop.permute.xlu0 %221 }
  0xb4   : > { %247 = vst.msk [vmem:[#allocation2 + $0x21] sm:$0xff] %vm243_vm2, %v226_v11  ;;  %245 = vst.msk [vmem:[#allocation2 + $0x9] sm:$0xff] %vm243_vm2, %v222_v12  ;;  %v3101_v11 = vsub.s32 %v737_v63, %v675_v51 }
  0xb7   : > { %v2932_v13 = vld [vmem:[#allocation2 + $0x18] sm:$0xff]  ;;  %v2936_v15 = vld [vmem:[#allocation2] sm:$0xff]  ;;  %v230_v16 = vpop.permute.xlu1 %229  ;;  %v228_v17 = vpop.permute.xlu0 %227 }
  0xb8   : > { %v2934_v14 = vld [vmem:[#allocation2 + $0x19] sm:$0xff]  ;;  %263 = vst.msk [vmem:[#allocation3 + $0x10] sm:$0xff] %vm260_vm3, %v2932_v13  ;;  %261 = vst.msk [vmem:[#allocation3] sm:$0xff] %vm260_vm3, %v2936_v15  ;;  %v2944_v18 = vld [vmem:[#allocation2 + $0x1] sm:$0xff] }
  0xb9   : > { %378 = vst.msk [vmem:[#allocation3 + $0xd0] sm:$0xff] %vm260_vm3, %v2934_v14  ;;  %376 = vst.msk [vmem:[#allocation3 + $0xc0] sm:$0xff] %vm260_vm3, %v2944_v18 }
  0xba   : > { %249 = vst.msk [vmem:[#allocation2 + $0x39] sm:$0xff] %vm243_vm2, %v230_v16  ;;  %248 = vst.msk [vmem:[#allocation2 + $0x31] sm:$0xff] %vm243_vm2, %v228_v17 }
  0xbb   : > { %v255_v19 = vld [vmem:[#allocation2 + $0x20] sm:$0xff]  ;;  %v234_v22 = vpop.permute.xlu1 %233  ;;  %v232_v23 = vpop.permute.xlu0 %231  ;;  %v253_v25 = vld [vmem:[#allocation2 + $0x8] sm:$0xff] }
  0xbc   : > { %v2950_v20 = vld [vmem:[#allocation2 + $0x21] sm:$0xff]  ;;  %264 = vst.msk [vmem:[#allocation3 + $0x18] sm:$0xff] %vm260_vm3, %v255_v19  ;;  %v368_v26 = vld [vmem:[#allocation2 + $0x9] sm:$0xff]  ;;  %291 = vrot.lane.b32.xlu1 %v255_v19, %s2760_s4  ;;  %262 = vst.msk [vmem:[#allocation3 + $0x8] sm:$0xff] %vm260_vm3, %v253_v25  ;;  %287 = vrot.lane.b32.xlu0 %v253_v25, %s2760_s4 }
  0xbd   : > { %v2952_v21 = vld [vmem:[#allocation2 + $0x1a] sm:$0xff]  ;;  %379 = vst.msk [vmem:[#allocation3 + $0xd8] sm:$0xff] %vm260_vm3, %v2950_v20  ;;  %v2957_v24 = vld [vmem:[#allocation2 + $0x22] sm:$0xff]  ;;  %377 = vst.msk [vmem:[#allocation3 + $0xc8] sm:$0xff] %vm260_vm3, %v368_v26 }
  0xbe   : > { %493 = vst.msk [vmem:[#allocation3 + $0x190] sm:$0xff] %vm260_vm3, %v2952_v21  ;;  %494 = vst.msk [vmem:[#allocation3 + $0x198] sm:$0xff] %vm260_vm3, %v2957_v24  ;;  %v2968_v27 = vld [vmem:[#allocation2 + $0x2] sm:$0xff]  ;;  %v2970_v28 = vld [vmem:[#allocation2 + $0xa] sm:$0xff] }
  0xbf   : > { %251 = vst.msk [vmem:[#allocation2 + $0x51] sm:$0xff] %vm243_vm2, %v234_v22  ;;  %250 = vst.msk [vmem:[#allocation2 + $0x49] sm:$0xff] %vm243_vm2, %v232_v23  ;;  %v3173_v46 = vld [vmem:[#allocation3] sm:$0xff] }
  0xc0   : > { %491 = vst.msk [vmem:[#allocation3 + $0x180] sm:$0xff] %vm260_vm3, %v2968_v27  ;;  %492 = vst.msk [vmem:[#allocation3 + $0x188] sm:$0xff] %vm260_vm3, %v2970_v28 }
  0xc1   : > { %v372_v29 = vld [vmem:[#allocation2 + $0x39] sm:$0xff]  ;;  %v256_v31 = vld [vmem:[#allocation2 + $0x30] sm:$0xff] }
  0xc2   : > { %v2977_v30 = vld [vmem:[#allocation2 + $0x3a] sm:$0xff]  ;;  %381 = vst.msk [vmem:[#allocation3 + $0xe8] sm:$0xff] %vm260_vm3, %v372_v29  ;;  %265 = vst.msk [vmem:[#allocation3 + $0x20] sm:$0xff] %vm260_vm3, %v256_v31  ;;  %v371_v33 = vld [vmem:[#allocation2 + $0x31] sm:$0xff] }
  0xc3   : > { %496 = vst.msk [vmem:[#allocation3 + $0x1a8] sm:$0xff] %vm260_vm3, %v2977_v30  ;;  %v257_v32 = vld [vmem:[#allocation2 + $0x38] sm:$0xff]  ;;  %380 = vst.msk [vmem:[#allocation3 + $0xe0] sm:$0xff] %vm260_vm3, %v371_v33  ;;  %v3071_v59 = vld [vmem:[#allocation3 + $0x8] sm:$0xff] }
  0xc4   : > { %v486_v34 = vld [vmem:[#allocation2 + $0x32] sm:$0xff]  ;;  %266 = vst.msk [vmem:[#allocation3 + $0x28] sm:$0xff] %vm260_vm3, %v257_v32  ;;  %295 = vrot.lane.b32.xlu0 %v257_v32, %s2760_s4 }
  0xc5   : > { %495 = vst.msk [vmem:[#allocation3 + $0x1a0] sm:$0xff] %vm260_vm3, %v486_v34  ;;  %v3065_v54 = vld [vmem:[#allocation3 + $0x18] sm:$0xff] }
  0xc6   : > { %v374_v35 = vld [vmem:[#allocation2 + $0x51] sm:$0xff]  ;;  %v258_v37 = vld [vmem:[#allocation2 + $0x48] sm:$0xff] }
  0xc7   : > { %v489_v36 = vld [vmem:[#allocation2 + $0x52] sm:$0xff]  ;;  %383 = vst.msk [vmem:[#allocation3 + $0xf8] sm:$0xff] %vm260_vm3, %v374_v35  ;;  %267 = vst.msk [vmem:[#allocation3 + $0x30] sm:$0xff] %vm260_vm3, %v258_v37  ;;  %v373_v39 = vld [vmem:[#allocation2 + $0x49] sm:$0xff] }
  0xc8   : > { %498 = vst.msk [vmem:[#allocation3 + $0x1b8] sm:$0xff] %vm260_vm3, %v489_v36  ;;  %v259_v38 = vld [vmem:[#allocation2 + $0x50] sm:$0xff]  ;;  %382 = vst.msk [vmem:[#allocation3 + $0xf0] sm:$0xff] %vm260_vm3, %v373_v39  ;;  %336 = vrot.lane.b32.xlu0 %v253_v25, %s2761_s6  ;;  %v3103_v12 = vld [vmem:[#allocation3 + $0xd8] sm:$0xff] }
  0xc9   : > { %v488_v40 = vld [vmem:[#allocation2 + $0x4a] sm:$0xff]  ;;  %268 = vst.msk [vmem:[#allocation3 + $0x38] sm:$0xff] %vm260_vm3, %v259_v38  ;;  %299 = vrot.lane.b32.xlu1 %v259_v38, %s2760_s4 }
  0xca   : > { %497 = vst.msk [vmem:[#allocation3 + $0x1b0] sm:$0xff] %vm260_vm3, %v488_v40 }
  0xcb   : > { %v3067_v55 = vld [vmem:[#allocation3 + $0x28] sm:$0xff] }
  0xcc   : > { %344 = vrot.lane.b32.xlu0 %v257_v32, %s2761_s6  ;;  %v1281_v62 = vcombine.low %v3071_v59, %v3067_v55 }
  0xcd   : > { %340 = vrot.lane.b32.xlu1 %v255_v19, %s2761_s6 }
  0xce   : > { %v3092_v8 = vld [vmem:[#allocation3 + $0xf8] sm:$0xff]  ;;  %v3097_v9 = vrot.slane %v1281_v62, %v3077_v61 }
  0xcf   : > { %v1465_v17 = vcombine.low %v3103_v12, %v3092_v8 }
  0xd0   : > { %285 = vrot.lane.b32.xlu0 %v2936_v15, %s2760_s4  ;;  %v3061_v49 = vld [vmem:[#allocation3 + $0x38] sm:$0xff] }
  0xd1   : > { %348 = vrot.lane.b32.xlu1 %v259_v38, %s2761_s6  ;;  %v1297_v56 = vcombine.low %v3065_v54, %v3061_v49 }
  0xd3   : > { %v3084_v2 = vrot.slane %v1297_v56, %v3077_v61 }
  0xd4   : > { %293 = vrot.lane.b32.xlu0 %v256_v31, %s2760_s4 }
  0xd5   : > { %289 = vrot.lane.b32.xlu1 %v2932_v13, %s2760_s4  ;;  %v1345_v16 = vcombine.low %v3097_v9, %v3084_v2 }
  0xd7   : > { %v3130_v25 = vrot.slane %v1345_v16, %v3101_v11 }
  0xd8   : > { %334 = vrot.lane.b32.xlu0 %v2936_v15, %s2761_s6 }
  0xd9   : > { %297 = vrot.lane.b32.xlu1 %v258_v37, %s2760_s4  ;;  %4286 = vst [vmem:[#allocation10_spill] sm:$0xff] %v3130_v25 }
  0xdc   : > { %342 = vrot.lane.b32.xlu0 %v256_v31, %s2761_s6 }
  0xdd   : > { %338 = vrot.lane.b32.xlu1 %v2932_v13, %s2761_s6  ;;  %v3105_v13 = vld [vmem:[#allocation3 + $0xe8] sm:$0xff] }
  0xe0   : > { %402 = vrot.lane.b32.xlu0 %v368_v26, %s2760_s4 }
  0xe1   : > { %346 = vrot.lane.b32.xlu1 %v258_v37, %s2761_s6 }
  0xe4   : > { %410 = vrot.lane.b32.xlu0 %v372_v29, %s2760_s4 }
  0xe5   : > { %406 = vrot.lane.b32.xlu1 %v2950_v20, %s2760_s4 }
  0xe8   : > { %451 = vrot.lane.b32.xlu0 %v368_v26, %s2761_s6 }
  0xe9   : > { %414 = vrot.lane.b32.xlu1 %v374_v35, %s2760_s4 }
  0xec   : > { %459 = vrot.lane.b32.xlu0 %v372_v29, %s2761_s6 }
  0xed   : > { %455 = vrot.lane.b32.xlu1 %v2950_v20, %s2761_s6 }
  0xf0   : > { %517 = vrot.lane.b32.xlu0 %v2970_v28, %s2760_s4 }
  0xf1   : > { %463 = vrot.lane.b32.xlu1 %v374_v35, %s2761_s6 }
  0xf4   : > { %525 = vrot.lane.b32.xlu0 %v2977_v30, %s2760_s4 }
  0xf5   : > { %521 = vrot.lane.b32.xlu1 %v2957_v24, %s2760_s4 }
  0xf8   : > { %400 = vrot.lane.b32.xlu0 %v2944_v18, %s2760_s4 }
  0xf9   : > { %529 = vrot.lane.b32.xlu1 %v489_v36, %s2760_s4 }
  0xfc   : > { %408 = vrot.lane.b32.xlu0 %v371_v33, %s2760_s4 }
  0xfd   : > { %404 = vrot.lane.b32.xlu1 %v2934_v14, %s2760_s4 }
 0x100   : > { %449 = vrot.lane.b32.xlu0 %v2944_v18, %s2761_s6 }
 0x101   : > { %412 = vrot.lane.b32.xlu1 %v373_v39, %s2760_s4 }
 0x104   : > { %457 = vrot.lane.b32.xlu0 %v371_v33, %s2761_s6 }
 0x105   : > { %453 = vrot.lane.b32.xlu1 %v2934_v14, %s2761_s6 }
 0x108   : > { %515 = vrot.lane.b32.xlu0 %v2968_v27, %s2760_s4 }
 0x109   : > { %461 = vrot.lane.b32.xlu1 %v373_v39, %s2761_s6 }
 0x10c   : > { %523 = vrot.lane.b32.xlu0 %v486_v34, %s2760_s4 }
 0x10d   : > { %519 = vrot.lane.b32.xlu1 %v2952_v21, %s2760_s4 }
 0x110   : > { %566 = vrot.lane.b32.xlu0 %v2970_v28, %s2761_s6  ;;  %v3138_v28 = vrot.slane %v1465_v17, %v3077_v61 }
 0x111   : > { %527 = vrot.lane.b32.xlu1 %v488_v40, %s2760_s4 }
 0x114   : > { %574 = vrot.lane.b32.xlu0 %v2977_v30, %s2761_s6 }
 0x115   : > { %570 = vrot.lane.b32.xlu1 %v2957_v24, %s2761_s6 }
 0x118   : > { %564 = vrot.lane.b32.xlu0 %v2968_v27, %s2761_s6 }
 0x119   : > { %578 = vrot.lane.b32.xlu1 %v489_v36, %s2761_s6  ;;  %v3153_v36 = vld [vmem:[#allocation3 + $0x30] sm:$0xff] }
 0x11c   : > { %572 = vrot.lane.b32.xlu0 %v486_v34, %s2761_s6 }
 0x11d   : > { %568 = vrot.lane.b32.xlu1 %v2952_v21, %s2761_s6  ;;  %v3119_v21 = vld [vmem:[#allocation3 + $0xc8] sm:$0xff] }
 0x11e   : > { %v1449_v23 = vcombine.low %v3119_v21, %v3105_v13 }
 0x120   : > { %v3149_v34 = vrot.slane %v1449_v23, %v3077_v61 }
 0x121   : > { %576 = vrot.lane.b32.xlu1 %v488_v40, %s2761_s6  ;;  %v3163_v40 = vld [vmem:[#allocation3 + $0x10] sm:$0xff] }
 0x122   : > { %v1513_v39 = vcombine.low %v3149_v34, %v3138_v28  ;;  %v685_v44 = vcombine.low %v3163_v40, %v3153_v36 }
 0x124   : > { %v3183_v51 = vrot.slane %v1513_v39, %v3101_v11  ;;  %v3192_v62 = vrot.slane %v685_v44, %v3077_v61 }
 0x126   : > { %4289 = vst [vmem:[#allocation13_spill] sm:$0xff] %v3183_v51 }
 0x12e   : > { %v292_v41 = vpop.permute.xlu1 %291  ;;  %v288_v42 = vpop.permute.xlu0 %287 }
 0x12f   : > { %313 = vst.msk [vmem:[#allocation3 + $0x58] sm:$0xff] %vm260_vm3, %v292_v41  ;;  %311 = vst.msk [vmem:[#allocation3 + $0x48] sm:$0xff] %vm260_vm3, %v288_v42  ;;  %v3165_v41 = vld [vmem:[#allocation3 + $0x20] sm:$0xff] }
 0x136   : > { %v296_v43 = vpop.permute.xlu0 %295  ;;  %v3081_v1 = vld [vmem:[#allocation3 + $0x48] sm:$0xff]  ;;  %v3088_v6 = vld [vmem:[#allocation3 + $0x58] sm:$0xff] }
 0x137   : > { %315 = vst.msk [vmem:[#allocation3 + $0x68] sm:$0xff] %vm260_vm3, %v296_v43 }
 0x13a   : > { %v337_v48 = vpop.permute.xlu0 %336 }
 0x13b   : > { %v300_v47 = vpop.permute.xlu1 %299  ;;  %360 = vst.msk [vmem:[#allocation3 + $0x88] sm:$0xff] %vm260_vm3, %v337_v48  ;;  %v669_v48 = vcombine.low %v3173_v46, %v3165_v41 }
 0x13c   : > { %317 = vst.msk [vmem:[#allocation3 + $0x78] sm:$0xff] %vm260_vm3, %v300_v47 }
 0x13d   : > { %v3207_v16 = vrot.slane %v669_v48, %v3077_v61 }
 0x13e   : > { %v345_v58 = vpop.permute.xlu0 %344  ;;  %v3073_v60 = vld [vmem:[#allocation3 + $0x68] sm:$0xff] }
 0x13f   : > { %v341_v57 = vpop.permute.xlu1 %340  ;;  %364 = vst.msk [vmem:[#allocation3 + $0xa8] sm:$0xff] %vm260_vm3, %v345_v58  ;;  %v1313_v3 = vcombine.low %v3081_v1, %v3073_v60  ;;  %v3189_v58 = vld [vmem:[#allocation3 + $0xf0] sm:$0xff] }
 0x140   : > { %362 = vst.msk [vmem:[#allocation3 + $0x98] sm:$0xff] %vm260_vm3, %v341_v57 }
 0x141   : > { %v3108_v14 = vrot.slane %v1313_v3, %v3077_v61 }
 0x142   : > { %v286_v5 = vpop.permute.xlu0 %285  ;;  %v3127_v24 = vld [vmem:[#allocation3 + $0x88] sm:$0xff] }
 0x143   : > { %v349_v4 = vpop.permute.xlu1 %348  ;;  %v3090_v7 = vld [vmem:[#allocation3 + $0x78] sm:$0xff]  ;;  %310 = vst.msk [vmem:[#allocation3 + $0x40] sm:$0xff] %vm260_vm3, %v286_v5  ;;  %v3202_v5 = vld [vmem:[#allocation3 + $0xd0] sm:$0xff] }
 0x144   : > { %366 = vst.msk [vmem:[#allocation3 + $0xb8] sm:$0xff] %vm260_vm3, %v349_v4  ;;  %v1329_v10 = vcombine.low %v3088_v6, %v3090_v7 }
 0x146   : > { %v3111_v15 = vrot.slane %v1329_v10, %v3077_v61  ;;  %v294_v19 = vpop.permute.xlu0 %293  ;;  %v3117_v20 = vld [vmem:[#allocation3 + $0xa8] sm:$0xff]  ;;  %v3204_v10 = vld [vmem:[#allocation3 + $0xe0] sm:$0xff] }
 0x147   : > { %v290_v18 = vpop.permute.xlu1 %289  ;;  %314 = vst.msk [vmem:[#allocation3 + $0x60] sm:$0xff] %vm260_vm3, %v294_v19  ;;  %v1417_v27 = vcombine.low %v3127_v24, %v3117_v20  ;;  %v3140_v31 = vld [vmem:[#allocation3 + $0x98] sm:$0xff] }
 0x148   : > { %312 = vst.msk [vmem:[#allocation3 + $0x50] sm:$0xff] %vm260_vm3, %v290_v18  ;;  %v1377_v22 = vcombine.low %v3108_v14, %v3111_v15  ;;  %v853_v18 = vcombine.low %v3202_v5, %v3189_v58 }
 0x149   : > { %v3156_v37 = vrot.slane %v1417_v27, %v3077_v61  ;;  %v3215_v27 = vld [vmem:[#allocation3 + $0xc0] sm:$0xff] }
 0x14a   : > { %v3133_v26 = vrot.slane %v1377_v22, %v3101_v11  ;;  %v335_v30 = vpop.permute.xlu0 %334  ;;  %v3185_v52 = vld [vmem:[#allocation3 + $0x40] sm:$0xff]  ;;  %v837_v39 = vcombine.low %v3215_v27, %v3204_v10 }
 0x14b   : > { %v298_v29 = vpop.permute.xlu1 %297  ;;  %v3142_v32 = vld [vmem:[#allocation3 + $0xb8] sm:$0xff]  ;;  %359 = vst.msk [vmem:[#allocation3 + $0x80] sm:$0xff] %vm260_vm3, %v335_v30  ;;  %4290 = vst [vmem:[#allocation14_spill] sm:$0xff] %v3185_v52 }
 0x14c   : > { %4287 = vst [vmem:[#allocation11_spill] sm:$0xff] %v3133_v26  ;;  %316 = vst.msk [vmem:[#allocation3 + $0x70] sm:$0xff] %vm260_vm3, %v298_v29  ;;  %v1433_v33 = vcombine.low %v3140_v31, %v3142_v32 }
 0x14e   : > { %v3159_v38 = vrot.slane %v1433_v33, %v3077_v61  ;;  %v343_v43 = vpop.permute.xlu0 %342  ;;  %v3175_v47 = vld [vmem:[#allocation3 + $0x60] sm:$0xff]  ;;  %v733_v33 = vcombine.low %v3207_v16, %v3192_v62 }
 0x14f   : > { %v339_v42 = vpop.permute.xlu1 %338  ;;  %363 = vst.msk [vmem:[#allocation3 + $0xa0] sm:$0xff] %vm260_vm3, %v343_v43  ;;  %4288 = vst [vmem:[#allocation12_spill] sm:$0xff] %v3175_v47  ;;  %v701_v63 = vcombine.low %v3185_v52, %v3175_v47  ;;  %v3200_v4 = vld [vmem:[#allocation3 + $0x50] sm:$0xff] }
 0x150   : > { %361 = vst.msk [vmem:[#allocation3 + $0x90] sm:$0xff] %vm260_vm3, %v339_v42  ;;  %v1481_v45 = vcombine.low %v3156_v37, %v3159_v38  ;;  %4292 = vst [vmem:[#allocation16_spill] sm:$0xff] %v3200_v4 }
 0x151   : > { %v3218_v29 = vrot.slane %v701_v63, %v3077_v61 }
 0x152   : > { %v3180_v50 = vrot.slane %v1481_v45, %v3101_v11  ;;  %v403_v56 = vpop.permute.xlu0 %402  ;;  %v3229_v42 = vld [vmem:[#allocation3 + $0x80] sm:$0xff]  ;;  %v3236_v45 = vrot.slane %v853_v18, %v3077_v61 }
 0x153   : > { %v347_v53 = vpop.permute.xlu1 %346  ;;  %v3187_v57 = vld [vmem:[#allocation3 + $0x70] sm:$0xff]  ;;  %426 = vst.msk [vmem:[#allocation3 + $0x108] sm:$0xff] %vm260_vm3, %v403_v56  ;;  %4294 = vst [vmem:[#allocation18_spill] sm:$0xff] %v3218_v29 }
 0x154   : > { %4291 = vst [vmem:[#allocation15_spill] sm:$0xff] %v3187_v57  ;;  %365 = vst.msk [vmem:[#allocation3 + $0xb0] sm:$0xff] %vm260_vm3, %v347_v53  ;;  %v717_v17 = vcombine.low %v3200_v4, %v3187_v57  ;;  %v3437_v57 = vld [vmem:[#allocation3 + $0x180] sm:$0xff] }
 0x155   : > { %4296 = vst [vmem:[#allocation20_spill] sm:$0xff] %v3229_v42  ;;  %4341 = vst [vmem:[#allocation65_spill] sm:$0xff] %v3437_v57 }
 0x156   : > { %v411_v22 = vpop.permute.xlu0 %410  ;;  %v3213_v23 = vld [vmem:[#allocation3 + $0xa0] sm:$0xff]  ;;  %v3221_v30 = vrot.slane %v717_v17, %v3077_v61  ;;  %v3243_v17 = vrot.slane %v733_v33, %v3101_v11 }
 0x157   : > { %v407_v19 = vpop.permute.xlu1 %406  ;;  %4293 = vst [vmem:[#allocation17_spill] sm:$0xff] %v3213_v23  ;;  %430 = vst.msk [vmem:[#allocation3 + $0x128] sm:$0xff] %vm260_vm3, %v411_v22  ;;  %v805_v44 = vcombine.low %v3229_v42, %v3213_v23  ;;  %v3238_v56 = vld [vmem:[#allocation3 + $0x90] sm:$0xff]  ;;  %v3253_v22 = vrot.slane %v837_v39, %v3077_v61  ;;  %v3329_v23 = vld [vmem:[#allocation3 + $0x188] sm:$0xff] }
 0x158   : > { %4295 = vst [vmem:[#allocation19_spill] sm:$0xff] %v3221_v30  ;;  %428 = vst.msk [vmem:[#allocation3 + $0x118] sm:$0xff] %vm260_vm3, %v407_v19  ;;  %v765_v43 = vcombine.low %v3218_v29, %v3221_v30 }
 0x159   : > { %4297 = vst [vmem:[#allocation21_spill] sm:$0xff] %v3243_v17  ;;  %v3258_v3 = vrot.slane %v805_v44, %v3077_v61  ;;  %4316 = vst [vmem:[#allocation40_spill] sm:$0xff] %v3329_v23 }
 0x15a   : > { %v452_v53 = vpop.permute.xlu0 %451  ;;  %v3246_v19 = vrot.slane %v765_v43, %v3101_v11  ;;  %v901_v43 = vcombine.low %v3253_v22, %v3236_v45  ;;  %v3287_v47 = vld [vmem:[#allocation3 + $0x108] sm:$0xff] }
 0x15b   : > { %v415_v48 = vpop.permute.xlu1 %414  ;;  %v3240_v63 = vld [vmem:[#allocation3 + $0xb0] sm:$0xff]  ;;  %475 = vst.msk [vmem:[#allocation3 + $0x148] sm:$0xff] %vm260_vm3, %v452_v53  ;;  %4304 = vst [vmem:[#allocation28_spill] sm:$0xff] %v3287_v47 }
 0x15c   : > { %4298 = vst [vmem:[#allocation22_spill] sm:$0xff] %v3246_v19  ;;  %432 = vst.msk [vmem:[#allocation3 + $0x138] sm:$0xff] %vm260_vm3, %v415_v48  ;;  %v821_v18 = vcombine.low %v3238_v56, %v3240_v63  ;;  %v3273_v44 = vrot.slane %v901_v43, %v3101_v11 }
 0x15e   : > { %v3261_v33 = vrot.slane %v821_v18, %v3077_v61  ;;  %v460_v53 = vpop.permute.xlu0 %459  ;;  %4300 = vst [vmem:[#allocation24_spill] sm:$0xff] %v3273_v44  ;;  %v3283_v19 = vld [vmem:[#allocation3 + $0x128] sm:$0xff] }
 0x15f   : > { %v456_v48 = vpop.permute.xlu1 %455  ;;  %479 = vst.msk [vmem:[#allocation3 + $0x168] sm:$0xff] %vm260_vm3, %v460_v53  ;;  %v3281_v53 = vld [vmem:[#allocation3 + $0x118] sm:$0xff]  ;;  %4303 = vst [vmem:[#allocation27_spill] sm:$0xff] %v3283_v19 }
 0x160   : > { %477 = vst.msk [vmem:[#allocation3 + $0x158] sm:$0xff] %vm260_vm3, %v456_v48  ;;  %v869_v39 = vcombine.low %v3258_v3, %v3261_v33  ;;  %4302 = vst [vmem:[#allocation26_spill] sm:$0xff] %v3281_v53 }
 0x162   : > { %v3270_v35 = vrot.slane %v869_v39, %v3101_v11  ;;  %v518_v0 = vpop.permute.xlu0 %517 }
 0x163   : > { %v464_v18 = vpop.permute.xlu1 %463  ;;  %v3275_v17 = vld [vmem:[#allocation3 + $0x138] sm:$0xff]  ;;  %541 = vst.msk [vmem:[#allocation3 + $0x1c8] sm:$0xff] %vm260_vm3, %v518_v0  ;;  %v1553_v0 = vcombine.low %v3287_v47, %v3283_v19  ;;  %v3317_v19 = vld [vmem:[#allocation3 + $0x1a8] sm:$0xff] }
 0x164   : > { %4299 = vst [vmem:[#allocation23_spill] sm:$0xff] %v3270_v35  ;;  %4301 = vst [vmem:[#allocation25_spill] sm:$0xff] %v3275_v17  ;;  %v1569_v39 = vcombine.low %v3281_v53, %v3275_v17  ;;  %v3315_v47 = vld [vmem:[#allocation3 + $0x198] sm:$0xff] }
 0x165   : > { %481 = vst.msk [vmem:[#allocation3 + $0x178] sm:$0xff] %vm260_vm3, %v464_v18  ;;  %v3295_v18 = vld [vmem:[#allocation3 + $0x148] sm:$0xff]  ;;  %4312 = vst [vmem:[#allocation36_spill] sm:$0xff] %v3315_v47 }
 0x166   : > { %v526_v52 = vpop.permute.xlu0 %525  ;;  %v3289_v29 = vld [vmem:[#allocation3 + $0x168] sm:$0xff]  ;;  %4306 = vst [vmem:[#allocation30_spill] sm:$0xff] %v3295_v18  ;;  %v3298_v48 = vrot.slane %v1569_v39, %v3077_v61  ;;  %4313 = vst [vmem:[#allocation37_spill] sm:$0xff] %v3317_v19 }
 0x167   : > { %v522_v43 = vpop.permute.xlu1 %521  ;;  %4305 = vst [vmem:[#allocation29_spill] sm:$0xff] %v3289_v29  ;;  %545 = vst.msk [vmem:[#allocation3 + $0x1e8] sm:$0xff] %vm260_vm3, %v526_v52  ;;  %v1585_v53 = vcombine.low %v3295_v18, %v3289_v29  ;;  %v3302_v44 = vld [vmem:[#allocation3 + $0x158] sm:$0xff]  ;;  %v3311_v52 = vrot.slane %v1553_v0, %v3077_v61 }
 0x168   : > { %543 = vst.msk [vmem:[#allocation3 + $0x1d8] sm:$0xff] %vm260_vm3, %v522_v43  ;;  %4307 = vst [vmem:[#allocation31_spill] sm:$0xff] %v3298_v48  ;;  %v3306_v43 = vld [vmem:[#allocation3 + $0x1b8] sm:$0xff] }
 0x169   : > { %4308 = vst [vmem:[#allocation32_spill] sm:$0xff] %v3302_v44  ;;  %4310 = vst [vmem:[#allocation34_spill] sm:$0xff] %v3306_v43  ;;  %v3320_v18 = vrot.slane %v1585_v53, %v3077_v61 }
 0x16a   : > { %v401_v35 = vpop.permute.xlu0 %400  ;;  %4311 = vst [vmem:[#allocation35_spill] sm:$0xff] %v3311_v52 }
 0x16b   : > { %v530_v17 = vpop.permute.xlu1 %529  ;;  %425 = vst.msk [vmem:[#allocation3 + $0x100] sm:$0xff] %vm260_vm3, %v401_v35  ;;  %4314 = vst [vmem:[#allocation38_spill] sm:$0xff] %v3320_v18  ;;  %v1705_v35 = vcombine.low %v3315_v47, %v3306_v43 }
 0x16c   : > { %v3304_v30 = vld [vmem:[#allocation3 + $0x178] sm:$0xff]  ;;  %547 = vst.msk [vmem:[#allocation3 + $0x1f8] sm:$0xff] %vm260_vm3, %v530_v17  ;;  %v1617_v17 = vcombine.low %v3311_v52, %v3298_v48 }
 0x16d   : > { %4309 = vst [vmem:[#allocation33_spill] sm:$0xff] %v3304_v30  ;;  %v1601_v39 = vcombine.low %v3302_v44, %v3304_v30  ;;  %v3339_v30 = vld [vmem:[#allocation3 + $0x1c8] sm:$0xff]  ;;  %v3348_v47 = vrot.slane %v1705_v35, %v3077_v61 }
 0x16e   : > { %v409_v42 = vpop.permute.xlu0 %408  ;;  %v3331_v44 = vld [vmem:[#allocation3 + $0x1e8] sm:$0xff]  ;;  %4318 = vst [vmem:[#allocation42_spill] sm:$0xff] %v3339_v30  ;;  %v3342_v52 = vrot.slane %v1617_v17, %v3101_v11 }
 0x16f   : > { %v3323_v29 = vrot.slane %v1601_v39, %v3077_v61  ;;  %v405_v0 = vpop.permute.xlu1 %404  ;;  %4317 = vst [vmem:[#allocation41_spill] sm:$0xff] %v3331_v44  ;;  %429 = vst.msk [vmem:[#allocation3 + $0x120] sm:$0xff] %vm260_vm3, %v409_v42  ;;  %v1689_v39 = vcombine.low %v3329_v23, %v3317_v19  ;;  %v1721_v42 = vcombine.low %v3339_v30, %v3331_v44 }
 0x170   : > { %427 = vst.msk [vmem:[#allocation3 + $0x110] sm:$0xff] %vm260_vm3, %v405_v0  ;;  %4319 = vst [vmem:[#allocation43_spill] sm:$0xff] %v3342_v52 }
 0x171   : > { %4315 = vst [vmem:[#allocation39_spill] sm:$0xff] %v3323_v29  ;;  %v1649_v53 = vcombine.low %v3320_v18, %v3323_v29  ;;  %v3352_v18 = vld [vmem:[#allocation3 + $0x1d8] sm:$0xff]  ;;  %v3366_v30 = vrot.slane %v1721_v42, %v3077_v61 }
 0x172   : > { %v450_v43 = vpop.permute.xlu0 %449  ;;  %4321 = vst [vmem:[#allocation45_spill] sm:$0xff] %v3352_v18 }
 0x173   : > { %v3345_v48 = vrot.slane %v1649_v53, %v3101_v11  ;;  %v413_v0 = vpop.permute.xlu1 %412  ;;  %v3354_v29 = vld [vmem:[#allocation3 + $0x1f8] sm:$0xff]  ;;  %474 = vst.msk [vmem:[#allocation3 + $0x140] sm:$0xff] %vm260_vm3, %v450_v43  ;;  %v3361_v53 = vrot.slane %v1689_v39, %v3077_v61  ;;  %4323 = vst [vmem:[#allocation47_spill] sm:$0xff] %v3366_v30 }
 0x174   : > { %4322 = vst [vmem:[#allocation46_spill] sm:$0xff] %v3354_v29  ;;  %431 = vst.msk [vmem:[#allocation3 + $0x130] sm:$0xff] %vm260_vm3, %v413_v0  ;;  %v1737_v35 = vcombine.low %v3352_v18, %v3354_v29 }
 0x175   : > { %4320 = vst [vmem:[#allocation44_spill] sm:$0xff] %v3345_v48  ;;  %v1753_v0 = vcombine.low %v3361_v53, %v3348_v47 }
 0x176   : > { %v3369_v44 = vrot.slane %v1737_v35, %v3077_v61  ;;  %v458_v43 = vpop.permute.xlu0 %457  ;;  %v3391_v52 = vld [vmem:[#allocation3 + $0x120] sm:$0xff] }
 0x177   : > { %v454_v23 = vpop.permute.xlu1 %453  ;;  %478 = vst.msk [vmem:[#allocation3 + $0x160] sm:$0xff] %vm260_vm3, %v458_v43  ;;  %v3378_v17 = vrot.slane %v1753_v0, %v3101_v11  ;;  %v3389_v43 = vld [vmem:[#allocation3 + $0x110] sm:$0xff]  ;;  %4329 = vst [vmem:[#allocation53_spill] sm:$0xff] %v3391_v52 }
 0x178   : > { %4324 = vst [vmem:[#allocation48_spill] sm:$0xff] %v3369_v44  ;;  %476 = vst.msk [vmem:[#allocation3 + $0x150] sm:$0xff] %vm260_vm3, %v454_v23  ;;  %v1785_v39 = vcombine.low %v3366_v30, %v3369_v44  ;;  %v3395_v30 = vld [vmem:[#allocation3 + $0x100] sm:$0xff] }
 0x179   : > { %4325 = vst [vmem:[#allocation49_spill] sm:$0xff] %v3378_v17  ;;  %4328 = vst [vmem:[#allocation52_spill] sm:$0xff] %v3389_v43 }
 0x17a   : > { %v3381_v42 = vrot.slane %v1785_v39, %v3101_v11  ;;  %v516_v18 = vpop.permute.xlu0 %515  ;;  %4330 = vst [vmem:[#allocation54_spill] sm:$0xff] %v3395_v30 }
 0x17b   : > { %v462_v35 = vpop.permute.xlu1 %461  ;;  %v3383_v29 = vld [vmem:[#allocation3 + $0x130] sm:$0xff]  ;;  %540 = vst.msk [vmem:[#allocation3 + $0x1c0] sm:$0xff] %vm260_vm3, %v516_v18  ;;  %v941_v18 = vcombine.low %v3395_v30, %v3391_v52  ;;  %v3425_v52 = vld [vmem:[#allocation3 + $0x1a0] sm:$0xff] }
 0x17c   : > { %4326 = vst [vmem:[#allocation50_spill] sm:$0xff] %v3381_v42  ;;  %4327 = vst [vmem:[#allocation51_spill] sm:$0xff] %v3383_v29  ;;  %v957_v0 = vcombine.low %v3389_v43, %v3383_v29  ;;  %v3423_v30 = vld [vmem:[#allocation3 + $0x190] sm:$0xff] }
 0x17d   : > { %480 = vst.msk [vmem:[#allocation3 + $0x170] sm:$0xff] %vm260_vm3, %v462_v35  ;;  %v3403_v35 = vld [vmem:[#allocation3 + $0x140] sm:$0xff]  ;;  %4338 = vst [vmem:[#allocation62_spill] sm:$0xff] %v3423_v30 }
 0x17e   : > { %v524_v48 = vpop.permute.xlu0 %523  ;;  %v3397_v44 = vld [vmem:[#allocation3 + $0x160] sm:$0xff]  ;;  %4332 = vst [vmem:[#allocation56_spill] sm:$0xff] %v3403_v35  ;;  %v3406_v23 = vrot.slane %v957_v0, %v3077_v61 }
 0x17f   : > { %v520_v39 = vpop.permute.xlu1 %519  ;;  %4331 = vst [vmem:[#allocation55_spill] sm:$0xff] %v3397_v44  ;;  %544 = vst.msk [vmem:[#allocation3 + $0x1e0] sm:$0xff] %vm260_vm3, %v524_v48  ;;  %v973_v43 = vcombine.low %v3403_v35, %v3397_v44  ;;  %v3410_v42 = vld [vmem:[#allocation3 + $0x150] sm:$0xff]  ;;  %v3419_v48 = vrot.slane %v941_v18, %v3077_v61 }
 0x180   : > { %542 = vst.msk [vmem:[#allocation3 + $0x1d0] sm:$0xff] %vm260_vm3, %v520_v39  ;;  %4333 = vst [vmem:[#allocation57_spill] sm:$0xff] %v3406_v23  ;;  %v3414_v39 = vld [vmem:[#allocation3 + $0x1b0] sm:$0xff] }
 0x181   : > { %4334 = vst [vmem:[#allocation58_spill] sm:$0xff] %v3410_v42  ;;  %4336 = vst [vmem:[#allocation60_spill] sm:$0xff] %v3414_v39  ;;  %v3428_v35 = vrot.slane %v973_v43, %v3077_v61 }
 0x182   : > { %v567_v17 = vpop.permute.xlu0 %566  ;;  %4337 = vst [vmem:[#allocation61_spill] sm:$0xff] %v3419_v48 }
 0x183   : > { %v528_v29 = vpop.permute.xlu1 %527  ;;  %590 = vst.msk [vmem:[#allocation3 + $0x208] sm:$0xff] %vm260_vm3, %v567_v17  ;;  %4339 = vst [vmem:[#allocation63_spill] sm:$0xff] %v3428_v35  ;;  %v1093_v17 = vcombine.low %v3423_v30, %v3414_v39 }
 0x184   : > { %v3412_v19 = vld [vmem:[#allocation3 + $0x170] sm:$0xff]  ;;  %546 = vst.msk [vmem:[#allocation3 + $0x1f0] sm:$0xff] %vm260_vm3, %v528_v29  ;;  %v1005_v29 = vcombine.low %v3419_v48, %v3406_v23 }
 0x185   : > { %4335 = vst [vmem:[#allocation59_spill] sm:$0xff] %v3412_v19  ;;  %v989_v0 = vcombine.low %v3410_v42, %v3412_v19  ;;  %v3447_v19 = vld [vmem:[#allocation3 + $0x1c0] sm:$0xff]  ;;  %v3456_v30 = vrot.slane %v1093_v17, %v3077_v61 }
 0x186   : > { %v575_v4 = vpop.permute.xlu0 %574  ;;  %v3439_v42 = vld [vmem:[#allocation3 + $0x1e0] sm:$0xff]  ;;  %4343 = vst [vmem:[#allocation67_spill] sm:$0xff] %v3447_v19  ;;  %v3450_v48 = vrot.slane %v1005_v29, %v3101_v11 }
 0x187   : > { %v3431_v44 = vrot.slane %v989_v0, %v3077_v61  ;;  %v571_v18 = vpop.permute.xlu1 %570  ;;  %4342 = vst [vmem:[#allocation66_spill] sm:$0xff] %v3439_v42  ;;  %594 = vst.msk [vmem:[#allocation3 + $0x228] sm:$0xff] %vm260_vm3, %v575_v4  ;;  %v1077_v0 = vcombine.low %v3437_v57, %v3425_v52  ;;  %v1109_v4 = vcombine.low %v3447_v19, %v3439_v42 }
 0x188   : > { %592 = vst.msk [vmem:[#allocation3 + $0x218] sm:$0xff] %vm260_vm3, %v571_v18  ;;  %4344 = vst [vmem:[#allocation68_spill] sm:$0xff] %v3450_v48 }
 0x189   : > { %4340 = vst [vmem:[#allocation64_spill] sm:$0xff] %v3431_v44  ;;  %v1037_v43 = vcombine.low %v3428_v35, %v3431_v44  ;;  %v1466_v35 = vcombine.high %v3103_v12, %v3092_v8  ;;  %v3462_v44 = vld [vmem:[#allocation3 + $0x1d0] sm:$0xff]  ;;  %v3471_v17 = vrot.slane %v1077_v0, %v3077_v61  ;;  %v1298_v8 = vcombine.high %v3065_v54, %v3061_v49 }
 0x18a   : > { %v565_v39 = vpop.permute.xlu0 %564  ;;  %4346 = vst [vmem:[#allocation70_spill] sm:$0xff] %v3462_v44  ;;  %v1450_v12 = vcombine.high %v3119_v21, %v3105_v13 }
 0x18b   : > { %v3453_v23 = vrot.slane %v1037_v43, %v3101_v11  ;;  %v579_v18 = vpop.permute.xlu1 %578  ;;  %v3464_v57 = vld [vmem:[#allocation3 + $0x1f0] sm:$0xff]  ;;  %589 = vst.msk [vmem:[#allocation3 + $0x200] sm:$0xff] %vm260_vm3, %v565_v39  ;;  %v3482_v39 = vrot.slane %v1109_v4, %v3077_v61  ;;  %v1141_v0 = vcombine.low %v3471_v17, %v3456_v30  ;;  %v3490_v49 = vrot.slane %v1466_v35, %v3077_v61 }
 0x18c   : > { %4347 = vst [vmem:[#allocation71_spill] sm:$0xff] %v3464_v57  ;;  %596 = vst.msk [vmem:[#allocation3 + $0x238] sm:$0xff] %vm260_vm3, %v579_v18  ;;  %v1125_v43 = vcombine.low %v3462_v44, %v3464_v57  ;;  %v1282_v18 = vcombine.high %v3071_v59, %v3067_v55  ;;  %v662_v55 = vld [vmem:[#allocation3 + $0x208] sm:$0xff]  ;;  %v3497_v59 = vrot.slane %v1298_v8, %v3077_v61 }
 0x18d   : > { %4345 = vst [vmem:[#allocation69_spill] sm:$0xff] %v3453_v23  ;;  %4348 = vst [vmem:[#allocation72_spill] sm:$0xff] %v3482_v39  ;;  %v3500_v13 = vrot.slane %v1450_v12, %v3077_v61  ;;  %v3506_v35 = vrot.slane %v1141_v0, %v3101_v11  ;;  %v1346_v8 = vcombine.high %v3097_v9, %v3084_v2 }
 0x18e   : > { %v3485_v29 = vrot.slane %v1125_v43, %v3077_v61  ;;  %v573_v42 = vpop.permute.xlu0 %572  ;;  %v666_v44 = vld [vmem:[#allocation3 + $0x228] sm:$0xff]  ;;  %v3503_v4 = vrot.slane %v1282_v18, %v3077_v61  ;;  %v1514_v12 = vcombine.high %v3149_v34, %v3138_v28  ;;  %v686_v18 = vcombine.high %v3163_v40, %v3153_v36 }
 0x18f   : > { %v569_v19 = vpop.permute.xlu1 %568  ;;  %593 = vst.msk [vmem:[#allocation3 + $0x220] sm:$0xff] %vm260_vm3, %v573_v42  ;;  %v1825_v21 = vcombine.low %v662_v55, %v666_v44  ;;  %4349 = vst [vmem:[#allocation73_spill] sm:$0xff] %v3506_v35  ;;  %v664_v43 = vld [vmem:[#allocation3 + $0x218] sm:$0xff]  ;;  %v1529_v48 = vcombine.low %v3500_v13, %v3490_v49  ;;  %v734_v9 = vcombine.high %v3207_v16, %v3192_v62 }
 0x190   : > { %591 = vst.msk [vmem:[#allocation3 + $0x210] sm:$0xff] %vm260_vm3, %v569_v19  ;;  %v1173_v54 = vcombine.low %v3482_v39, %v3485_v29  ;;  %v1361_v2 = vcombine.low %v3503_v4, %v3497_v59  ;;  %v670_v28 = vcombine.high %v3173_v46, %v3165_v41  ;;  %v3541_v62 = vrot.slane %v1514_v12, %v3101_v11 }
 0x191   : > { %v3529_v34 = vrot.slane %v1825_v21, %v3077_v61  ;;  %v3544_v41 = vrot.slane %v686_v18, %v3077_v61  ;;  %v838_v46 = vcombine.high %v3215_v27, %v3204_v10  ;;  %v1754_v27 = vcombine.high %v3361_v53, %v3348_v47 }
 0x192   : > { %v3509_v19 = vrot.slane %v1173_v54, %v3101_v11  ;;  %v1826_v54 = vcombine.high %v662_v55, %v666_v44  ;;  %v3538_v55 = vrot.slane %v1346_v8, %v3101_v11  ;;  %v661_v21 = vld [vmem:[#allocation3 + $0x200] sm:$0xff]  ;;  %v3563_v10 = vrot.slane %v670_v28, %v3077_v61 }
 0x193   : > { %v577_v42 = vpop.permute.xlu1 %576  ;;  %v668_v57 = vld [vmem:[#allocation3 + $0x238] sm:$0xff]  ;;  %v1530_v47 = vcombine.high %v3500_v13, %v3490_v49 }
 0x194   : > { %4350 = vst [vmem:[#allocation74_spill] sm:$0xff] %v3509_v19  ;;  %595 = vst.msk [vmem:[#allocation3 + $0x230] sm:$0xff] %vm260_vm3, %v577_v42  ;;  %v1841_v0 = vcombine.low %v664_v43, %v668_v57  ;;  %v1842_v23 = vcombine.high %v664_v43, %v668_v57  ;;  %v902_v57 = vcombine.high %v3253_v22, %v3236_v45 }
 0x195   : > { %v3552_v45 = vrot.slane %v1529_v48, %v3101_v11  ;;  %v854_v22 = vcombine.high %v3202_v5, %v3189_v58  ;;  %v3557_v42 = vrot.slane %v1361_v2, %v3101_v11  ;;  %v3560_v43 = vrot.slane %v734_v9, %v3101_v11 }
 0x196   : > { %v3532_v36 = vrot.slane %v1841_v0, %v3077_v61  ;;  %v1856_v40 = vrot.slane %v1842_v23, %v3077_v61  ;;  %v665_v44 = vld [vmem:[#allocation3 + $0x220] sm:$0xff]  ;;  %v1840_v23 = vrot.slane %v1826_v54, %v3077_v61  ;;  %v3571_v58 = vrot.slane %v902_v57, %v3101_v11 }
 0x197   : > { %v1213_v12 = vcombine.low %v661_v21, %v665_v44  ;;  %v663_v5 = vld [vmem:[#allocation3 + $0x210] sm:$0xff]  ;;  %v749_v0 = vcombine.low %v3563_v10, %v3544_v41  ;;  %v3576_v54 = vrot.slane %v838_v46, %v3077_v61  ;;  %v1362_v2 = vcombine.high %v3503_v4, %v3497_v59 }
 0x198   : > { %v1858_v16 = vcombine.high %v3529_v34, %v3532_v36  ;;  %v1873_v48 = vcombine.low %v1840_v23, %v1856_v40  ;;  %v1214_v9 = vcombine.high %v661_v21, %v665_v44  ;;  %v3585_v57 = vrot.slane %v854_v22, %v3077_v61 }
 0x199   : > { %v1482_v46 = vcombine.high %v3156_v37, %v3159_v38  ;;  %v1434_v59 = vcombine.high %v3140_v31, %v3142_v32  ;;  %v3592_v4 = vrot.slane %v1754_v27, %v3101_v11  ;;  %v3598_v13 = vrot.slane %v1213_v12, %v3077_v61 }
 0x19a   : > { %v3568_v8 = vrot.slane %v1858_v16, %v3101_v11  ;;  %v1874_v16 = vcombine.high %v1840_v23, %v1856_v40  ;;  %v3595_v49 = vrot.slane %v1873_v48, %v3101_v11  ;;  %v1330_v37 = vcombine.high %v3088_v6, %v3090_v7 }
 0x19b   : > { %v667_v18 = vld [vmem:[#allocation3 + $0x230] sm:$0xff]  ;;  %v1418_v31 = vcombine.high %v3127_v24, %v3117_v20  ;;  %v1142_v32 = vcombine.high %v3471_v17, %v3456_v30  ;;  %v3611_v38 = vrot.slane %v1362_v2, %v3101_v11  ;;  %v1228_v22 = vrot.slane %v1214_v9, %v3077_v61 }
 0x19c   : > { %2066 = vrot.lane.b32.xlu0 %v3568_v8, %s2764_s7  ;;  %v1229_v53 = vcombine.low %v663_v5, %v667_v18  ;;  %v1230_v28 = vcombine.high %v663_v5, %v667_v18  ;;  %v1378_v6 = vcombine.high %v3108_v14, %v3111_v15  ;;  %v3621_v7 = vrot.slane %v1530_v47, %v3101_v11 }
 0x19d   : > { %v1496_v20 = vrot.slane %v1482_v46, %v3101_v11  ;;  %v1314_v24 = vcombine.high %v3081_v1, %v3073_v60  ;;  %v3627_v30 = vrot.slane %v1434_v59, %v3077_v61  ;;  %v3630_v17 = vrot.slane %v749_v0, %v3101_v11  ;;  %v4351_v59 = vld [vmem:[#allocation15_spill] sm:$0xff] }
 0x19e   : > { %v3601_v44 = vrot.slane %v1229_v53, %v3077_v61  ;;  %v1244_v40 = vrot.slane %v1230_v28, %v3077_v61  ;;  %v3633_v21 = vrot.slane %v1874_v16, %v3101_v11  ;;  %v1546_v15 = vcombine.high %v3180_v50, %v3183_v51 }
 0x19f   : > { %v3641_v48 = vrot.slane %v1330_v37, %v3077_v61  ;;  %v3644_v60 = vrot.slane %v1418_v31, %v3077_v61  ;;  %v917_v1 = vcombine.low %v3576_v54, %v3585_v57  ;;  %v750_v12 = vcombine.high %v3563_v10, %v3544_v41  ;;  %v4352_v37 = vld [vmem:[#allocation16_spill] sm:$0xff] }
 0x1a0   : > { %2106 = vrot.lane.b32.xlu0 %v3595_v49, %s2765_s8  ;;  %v1246_v23 = vcombine.high %v3598_v13, %v3601_v44  ;;  %v1261_v14 = vcombine.low %v1228_v22, %v1244_v40  ;;  %v1410_v5 = vcombine.high %v3130_v25, %v3133_v26  ;;  %v1392_v18 = vrot.slane %v1378_v6, %v3101_v11  ;;  %v4372_v26 = vld [vmem:[#allocation48_spill] sm:$0xff]  ;;  %v4373_v25 = vld [vmem:[#allocation47_spill] sm:$0xff] }
 0x1a1   : > { %v3658_v0 = vrot.slane %v1142_v32, %v3101_v11  ;;  %v1547_v2 = vcombine.low %v1496_v20, %v3541_v62  ;;  %v3662_v47 = vrot.slane %v1314_v24, %v3077_v61  ;;  %v1497_v41 = vcombine.low %v3644_v60, %v3627_v30  ;;  %v4353_v32 = vld [vmem:[#allocation17_spill] sm:$0xff]  ;;  %v4358_v24 = vld [vmem:[#allocation36_spill] sm:$0xff] }
 0x1a2   : > { %v3636_v27 = vrot.slane %v1246_v23, %v3101_v11  ;;  %v822_v10 = vcombine.high %v3238_v56, %v3240_v63  ;;  %v3669_v53 = vrot.slane %v1261_v14, %v3101_v11  ;;  %v2516_v9 = vpack.i.bf16 %v1546_v15, %v1410_v5  ;;  %v4354_v23 = vld [vmem:[#allocation20_spill] sm:$0xff]  ;;  %v4355_v63 = vld [vmem:[#allocation19_spill] sm:$0xff] }
 0x1a3   : > { %v1262_v28 = vcombine.high %v1228_v22, %v1244_v40  ;;  %v870_v16 = vcombine.high %v3258_v3, %v3261_v33  ;;  %v1393_v46 = vcombine.low %v3662_v47, %v3641_v48  ;;  %v718_v31 = vcombine.high %v4352_v37, %v4351_v59  ;;  %v4356_v33 = vld [vmem:[#allocation18_spill] sm:$0xff] }
 0x1a4   : > { %2146 = vrot.lane.b32.xlu0 %v3633_v21, %s2766_s17  ;;  %1926 = vrot.lane.b32.xlu1 %v3636_v27, %s2764_s7  ;;  %v806_v6 = vcombine.high %v4354_v23, %v4353_v32  ;;  %v918_v56 = vcombine.high %v3576_v54, %v3585_v57  ;;  %v1411_v3 = vcombine.low %v3538_v55, %v1392_v18  ;;  %v4357_v22 = vld [vmem:[#allocation34_spill] sm:$0xff]  ;;  %v4359_v54 = vld [vmem:[#allocation12_spill] sm:$0xff] }
 0x1a5   : > { %v766_v40 = vcombine.high %v4356_v33, %v4355_v63  ;;  %v1706_v14 = vcombine.high %v4358_v24, %v4357_v22  ;;  %v1548_v15 = vcombine.high %v1496_v20, %v3541_v62  ;;  %v3691_v5 = vrot.slane %v1497_v41, %v3101_v11  ;;  %v4360_v57 = vld [vmem:[#allocation14_spill] sm:$0xff]  ;;  %v4361_v23 = vld [vmem:[#allocation24_spill] sm:$0xff]  ;;  %v4362_v63 = vld [vmem:[#allocation23_spill] sm:$0xff] }
 0x1a6   : > { %v702_v59 = vcombine.high %v4360_v57, %v4359_v54  ;;  %v3696_v37 = vrot.slane %v822_v10, %v3077_v61  ;;  %v2526_v32 = vpack.i.bf16 %v1547_v2, %v1411_v3  ;;  %v934_v33 = vcombine.high %v4362_v63, %v4361_v23  ;;  %v4363_v10 = vld [vmem:[#allocation37_spill] sm:$0xff]  ;;  %v4364_v24 = vld [vmem:[#allocation40_spill] sm:$0xff] }
 0x1a7   : > { %v884_v22 = vrot.slane %v870_v16, %v3101_v11  ;;  %v3705_v62 = vrot.slane %v1393_v46, %v3101_v11  ;;  %v3708_v20 = vrot.slane %v718_v31, %v3077_v61  ;;  %v3711_v41 = vrot.slane %v806_v6, %v3077_v61  ;;  %v4366_v16 = vld [vmem:[#allocation21_spill] sm:$0xff] }
 0x1a8   : > { %1966 = vrot.lane.b32.xlu1 %v3669_v53, %s2765_s8  ;;  %2517 = vrot.lane.b32.xlu0 %v2516_v9, %s2767_s19  ;;  %v3699_v9 = vrot.slane %v1262_v28, %v3101_v11  ;;  %v1690_v54 = vcombine.high %v4364_v24, %v4363_v10  ;;  %v1412_v2 = vcombine.high %v3538_v55, %v1392_v18  ;;  %v4365_v28 = vld [vmem:[#allocation22_spill] sm:$0xff]  ;;  %v4371_v23 = vld [vmem:[#allocation49_spill] sm:$0xff] }
 0x1a9   : > { %v798_v46 = vcombine.high %v4366_v16, %v4365_v28  ;;  %v780_v3 = vrot.slane %v766_v40, %v3101_v11  ;;  %v3723_v31 = vrot.slane %v702_v59, %v3077_v61  ;;  %v885_v6 = vcombine.low %v3711_v41, %v3696_v37  ;;  %v4370_v16 = vld [vmem:[#allocation50_spill] sm:$0xff] }
 0x1aa   : > { %v3728_v57 = vrot.slane %v917_v1, %v3101_v11  ;;  %v3731_v10 = vrot.slane %v1706_v14, %v3077_v61  ;;  %v1549_v55 = vcombine.low %v3691_v5, %v3552_v45  ;;  %v935_v18 = vcombine.low %v884_v22, %v3571_v58  ;;  %v4367_v1 = vld [vmem:[#allocation65_spill] sm:$0xff] }
 0x1ab   : > { %v2521_v24 = vpack.i.bf16 %v934_v33, %v798_v46  ;;  %v781_v40 = vcombine.low %v3723_v31, %v3708_v20  ;;  %v3739_v59 = vrot.slane %v750_v12, %v3101_v11  ;;  %v3742_v39 = vrot.slane %v1690_v54, %v3077_v61  ;;  %v4369_v46 = vld [vmem:[#allocation62_spill] sm:$0xff] }
 0x1ac   : > { %2006 = vrot.lane.b32.xlu1 %v3699_v9, %s2766_s17  ;;  %2527 = vrot.lane.b32.xlu0 %v2526_v32, %s2764_s7  ;;  %v2536_v32 = vpack.i.bf16 %v1548_v15, %v1412_v2  ;;  %v1078_v14 = vcombine.high %v4367_v1, %v3425_v52  ;;  %v1413_v15 = vcombine.low %v3557_v42, %v3705_v62  ;;  %v4368_v2 = vld [vmem:[#allocation60_spill] sm:$0xff] }
 0x1ad   : > { %v799_v33 = vcombine.low %v3560_v43, %v780_v3  ;;  %v1094_v12 = vcombine.high %v4369_v46, %v4368_v2  ;;  %v936_v28 = vcombine.high %v884_v22, %v3571_v58  ;;  %v3755_v54 = vrot.slane %v885_v6, %v3101_v11  ;;  %v4374_v6 = vld [vmem:[#allocation44_spill] sm:$0xff] }
 0x1ae   : > { %v3758_v52 = vrot.slane %v918_v56, %v3101_v11  ;;  %v1818_v63 = vcombine.high %v4371_v23, %v4370_v16  ;;  %v1786_v51 = vcombine.high %v4373_v25, %v4372_v26  ;;  %v800_v2 = vcombine.high %v3560_v43, %v780_v3  ;;  %v4377_v25 = vld [vmem:[#allocation38_spill] sm:$0xff] }
 0x1af   : > { %v2531_v1 = vpack.i.bf16 %v935_v18, %v799_v33  ;;  %v3768_v58 = vrot.slane %v781_v40, %v3101_v11  ;;  %v1498_v56 = vcombine.high %v3644_v60, %v3627_v30  ;;  %v3773_v22 = vrot.slane %v1078_v14, %v3077_v61  ;;  %v4378_v60 = vld [vmem:[#allocation31_spill] sm:$0xff] }
 0x1b0   : > { %2537 = vrot.lane.b32.xlu0 %v2536_v32, %s2768_s20  ;;  %2522 = vrot.lane.b32.xlu1 %v2521_v24, %s2767_s19  ;;  %v1769_v32 = vcombine.low %v3742_v39, %v3731_v10  ;;  %v2546_v24 = vpack.i.bf16 %v1549_v55, %v1413_v15  ;;  %v4375_v55 = vld [vmem:[#allocation43_spill] sm:$0xff]  ;;  %v3782_v43 = vrot.slane %v1094_v12, %v3077_v61  ;;  %v4380_v12 = vld [vmem:[#allocation72_spill] sm:$0xff] }
 0x1b1   : > { %v1682_v18 = vcombine.high %v4375_v55, %v4374_v6  ;;  %v4376_v15 = vld [vmem:[#allocation39_spill] sm:$0xff]  ;;  %v2541_v3 = vpack.i.bf16 %v936_v28, %v800_v2  ;;  %v937_v30 = vcombine.low %v3755_v54, %v3728_v57  ;;  %v801_v28 = vcombine.low %v3630_v17, %v3768_v58  ;;  %v4395_v6 = vld [vmem:[#allocation29_spill] sm:$0xff]  ;;  %v4396_v55 = vld [vmem:[#allocation30_spill] sm:$0xff] }
 0x1b2   : > { %v1650_v26 = vcombine.high %v4377_v25, %v4376_v15  ;;  %v4379_v40 = vld [vmem:[#allocation35_spill] sm:$0xff]  ;;  %v3789_v33 = vrot.slane %v1769_v32, %v3101_v11  ;;  %v1174_v15 = vcombine.high %v4380_v12, %v3485_v29  ;;  %v1550_v2 = vcombine.high %v3691_v5, %v3552_v45  ;;  %v4386_v5 = vld [vmem:[#allocation45_spill] sm:$0xff] }
 0x1b3   : > { %v1618_v14 = vcombine.high %v4379_v40, %v4378_v60  ;;  %v2556_v46 = vpack.i.bf16 %v1818_v63, %v1682_v18  ;;  %v1394_v32 = vcombine.high %v3662_v47, %v3641_v48  ;;  %v3805_v63 = vrot.slane %v1498_v56, %v3101_v11  ;;  %v4382_v18 = vld [vmem:[#allocation68_spill] sm:$0xff]  ;;  %v4384_v40 = vld [vmem:[#allocation63_spill] sm:$0xff]  ;;  %v4385_v47 = vld [vmem:[#allocation46_spill] sm:$0xff] }
 0x1b4   : > { %2547 = vrot.lane.b32.xlu0 %v2546_v24, %s2765_s8  ;;  %2532 = vrot.lane.b32.xlu1 %v2531_v1, %s2764_s7  ;;  %v1206_v24 = vcombine.high %v3506_v35, %v3509_v19  ;;  %v3794_v1 = vrot.slane %v1786_v51, %v3101_v11  ;;  %v4381_v51 = vld [vmem:[#allocation69_spill] sm:$0xff]  ;;  %v1664_v29 = vrot.slane %v1650_v26, %v3101_v11  ;;  %v4383_v60 = vld [vmem:[#allocation64_spill] sm:$0xff] }
 0x1b5   : > { %v1070_v25 = vcombine.high %v4382_v18, %v4381_v51  ;;  %v1038_v12 = vcombine.high %v4384_v40, %v4383_v60  ;;  %v2551_v19 = vpack.i.bf16 %v937_v30, %v801_v28  ;;  %v1632_v45 = vrot.slane %v1618_v14, %v3101_v11  ;;  %v4387_v35 = vld [vmem:[#allocation57_spill] sm:$0xff] }
 0x1b6   : > { %v1414_v48 = vcombine.high %v3557_v42, %v3705_v62  ;;  %v1738_v56 = vcombine.high %v4386_v5, %v4385_v47  ;;  %v4388_v51 = vld [vmem:[#allocation61_spill] sm:$0xff]  ;;  %v3824_v26 = vrot.slane %v1174_v15, %v3101_v11  ;;  %v3827_v30 = vrot.slane %v1394_v32, %v3101_v11  ;;  %v4390_v62 = vld [vmem:[#allocation32_spill] sm:$0xff]  ;;  %v4394_v47 = vld [vmem:[#allocation26_spill] sm:$0xff] }
 0x1b7   : > { %v1006_v18 = vcombine.high %v4388_v51, %v4387_v35  ;;  %v1551_v14 = vcombine.low %v3805_v63, %v3621_v7  ;;  %v4389_v42 = vld [vmem:[#allocation33_spill] sm:$0xff]  ;;  %v1683_v35 = vcombine.low %v1632_v45, %v1664_v29  ;;  %v1052_v15 = vrot.slane %v1038_v12, %v3101_v11  ;;  %v4398_v12 = vld [vmem:[#allocation28_spill] sm:$0xff] }
 0x1b8   : > { %2557 = vrot.lane.b32.xlu0 %v2556_v46, %s2767_s19  ;;  %2542 = vrot.lane.b32.xlu1 %v2541_v3, %s2768_s20  ;;  %v2566_v46 = vpack.i.bf16 %v1206_v24, %v1070_v25  ;;  %v1819_v3 = vcombine.low %v3592_v4, %v3794_v1  ;;  %v1602_v28 = vcombine.high %v4390_v62, %v4389_v42  ;;  %v4391_v60 = vld [vmem:[#allocation41_spill] sm:$0xff]  ;;  %v4392_v24 = vld [vmem:[#allocation42_spill] sm:$0xff] }
 0x1b9   : > { %v1722_v25 = vcombine.high %v4392_v24, %v4391_v60  ;;  %v2561_v51 = vpack.i.bf16 %v1550_v2, %v1414_v48  ;;  %v886_v32 = vcombine.high %v3711_v41, %v3696_v37  ;;  %v4393_v40 = vld [vmem:[#allocation25_spill] sm:$0xff]  ;;  %v1586_v42 = vcombine.high %v4396_v55, %v4395_v6  ;;  %v4397_v41 = vld [vmem:[#allocation27_spill] sm:$0xff] }
 0x1ba   : > { %v1570_v5 = vcombine.high %v4394_v47, %v4393_v40  ;;  %v3845_v62 = vrot.slane %v1738_v56, %v3077_v61  ;;  %v2576_v60 = vpack.i.bf16 %v1819_v3, %v1683_v35  ;;  %v938_v2 = vcombine.high %v3755_v54, %v3728_v57  ;;  %v4399_v35 = vld [vmem:[#allocation71_spill] sm:$0xff] }
 0x1bb   : > { %v782_v37 = vcombine.high %v3723_v31, %v3708_v20  ;;  %v1554_v48 = vcombine.high %v4398_v12, %v4397_v41  ;;  %v3857_v6 = vrot.slane %v1602_v28, %v3077_v61  ;;  %v1736_v55 = vrot.slane %v1722_v25, %v3077_v61  ;;  %v4405_v12 = vld [vmem:[#allocation51_spill] sm:$0xff] }
 0x1bc   : > { %2567 = vrot.lane.b32.xlu0 %v2566_v46, %s2767_s19  ;;  %2552 = vrot.lane.b32.xlu1 %v2551_v19, %s2765_s8  ;;  %v1020_v46 = vrot.slane %v1006_v18, %v3101_v11  ;;  %v1207_v19 = vcombine.low %v3658_v0, %v3824_v26  ;;  %v802_v57 = vcombine.high %v3630_v17, %v3768_v58  ;;  %v4400_v17 = vld [vmem:[#allocation70_spill] sm:$0xff] }
 0x1bd   : > { %v1415_v20 = vcombine.low %v3611_v38, %v3827_v30  ;;  %v3867_v31 = vrot.slane %v886_v32, %v3101_v11  ;;  %v3870_v54 = vrot.slane %v1570_v5, %v3077_v61  ;;  %v1600_v56 = vrot.slane %v1586_v42, %v3077_v61  ;;  %v4401_v42 = vld [vmem:[#allocation59_spill] sm:$0xff] }
 0x1be   : > { %v1071_v18 = vcombine.low %v1020_v46, %v1052_v15  ;;  %v1801_v3 = vcombine.low %v1736_v55, %v3845_v62  ;;  %v2571_v24 = vpack.i.bf16 %v938_v2, %v802_v57  ;;  %v1820_v25 = vcombine.high %v3592_v4, %v3794_v1  ;;  %v4403_v2 = vld [vmem:[#allocation66_spill] sm:$0xff]  ;;  %v4404_v4 = vld [vmem:[#allocation67_spill] sm:$0xff] }
 0x1bf   : > { %v1126_v58 = vcombine.high %v4400_v17, %v4399_v35  ;;  %v796_v40 = vrot.slane %v782_v37, %v3101_v11  ;;  %v1568_v32 = vrot.slane %v1554_v48, %v3077_v61  ;;  %v1665_v47 = vcombine.low %v1600_v56, %v3857_v6  ;;  %v4406_v48 = vld [vmem:[#allocation52_spill] sm:$0xff] }
 0x1c0   : > { %2577 = vrot.lane.b32.xlu0 %v2576_v60, %s2764_s7  ;;  %2562 = vrot.lane.b32.xlu1 %v2561_v51, %s2769_s22  ;;  %v2586_v28 = vpack.i.bf16 %v1207_v19, %v1071_v18  ;;  %v2581_v51 = vpack.i.bf16 %v1551_v14, %v1415_v20  ;;  %v1684_v5 = vcombine.high %v1632_v45, %v1664_v29  ;;  %v4402_v60 = vld [vmem:[#allocation58_spill] sm:$0xff]  ;;  %v4407_v45 = vld [vmem:[#allocation55_spill] sm:$0xff]  ;;  %v4408_v20 = vld [vmem:[#allocation56_spill] sm:$0xff] }
 0x1c1   : > { %v990_v19 = vcombine.high %v4402_v60, %v4401_v42  ;;  %v1110_v1 = vcombine.high %v4404_v4, %v4403_v2  ;;  %v939_v14 = vcombine.low %v3867_v31, %v3758_v52  ;;  %v1633_v37 = vcombine.low %v1568_v32, %v3870_v54  ;;  %v4410_v60 = vld [vmem:[#allocation54_spill] sm:$0xff] }
 0x1c2   : > { %v1809_v41 = vrot.slane %v1801_v3, %v3101_v11  ;;  %v958_v18 = vcombine.high %v4406_v48, %v4405_v12  ;;  %v2596_v57 = vpack.i.bf16 %v1820_v25, %v1684_v5  ;;  %v1208_v29 = vcombine.high %v3658_v0, %v3824_v26  ;;  %v4409_v3 = vld [vmem:[#allocation53_spill] sm:$0xff] }
 0x1c3   : > { %v803_v35 = vcombine.low %v3739_v59, %v796_v40  ;;  %v1673_v17 = vrot.slane %v1665_v47, %v3101_v11  ;;  %v1552_v42 = vcombine.high %v3805_v63, %v3621_v7  ;;  %v942_v2 = vcombine.high %v4410_v60, %v4409_v3 }
 0x1c4   : > { %2587 = vrot.lane.b32.xlu0 %v2586_v28, %s2764_s7  ;;  %2572 = vrot.lane.b32.xlu1 %v2571_v24, %s2769_s22  ;;  %v974_v28 = vcombine.high %v4408_v20, %v4407_v45  ;;  %v1140_v24 = vrot.slane %v1126_v58, %v3077_v61  ;;  %v1072_v0 = vcombine.high %v1020_v46, %v1052_v15  ;;  %s4155_s7 = scalar_lea.hbm %s4202_s3, %s2445_s10 }
 0x1c5   : > { %v1004_v26 = vrot.slane %v990_v19, %v3077_v61  ;;  %v1124_v25 = vrot.slane %v1110_v1, %v3077_v61  ;;  %v2591_v58 = vpack.i.bf16 %v939_v14, %v803_v35  ;;  %v1641_v5 = vrot.slane %v1633_v37, %v3101_v11 }
 0x1c6   : > { %v1821_v47 = vcombine.low %v3789_v33, %v1809_v41  ;;  %v1802_v4 = vcombine.high %v1736_v55, %v3845_v62  ;;  %v2606_v7 = vpack.i.bf16 %v1208_v29, %v1072_v0  ;;  %v972_v63 = vrot.slane %v958_v18, %v3077_v61 }
 0x1c7   : > { %v988_v12 = vrot.slane %v974_v28, %v3077_v61  ;;  %v1189_v48 = vcombine.low %v1124_v25, %v1140_v24  ;;  %v1416_v15 = vcombine.high %v3611_v38, %v3827_v30  ;;  %v1666_v46 = vcombine.high %v1600_v56, %v3857_v6 }
 0x1c8   : > { %2597 = vrot.lane.b32.xlu0 %v2596_v57, %s2768_s20  ;;  %2582 = vrot.lane.b32.xlu1 %v2581_v51, %s2766_s17  ;;  %v1770_v51 = vcombine.high %v3742_v39, %v3731_v10  ;;  %v1157_v19 = vcombine.low %v3773_v22, %v3782_v43  ;;  %v1685_v62 = vcombine.low %v1641_v5, %v1673_v17 }
 0x1c9   : > { %v956_v55 = vrot.slane %v942_v2, %v3077_v61  ;;  %v1053_v1 = vcombine.low %v988_v12, %v1004_v26  ;;  %v2601_v14 = vpack.i.bf16 %v1552_v42, %v1416_v15  ;;  %v940_v38 = vcombine.high %v3867_v31, %v3758_v52 }
 0x1ca   : > { %v1634_v30 = vcombine.high %v1568_v32, %v3870_v54  ;;  %v1816_v6 = vrot.slane %v1802_v4, %v3101_v11  ;;  %v2616_v39 = vpack.i.bf16 %v1821_v47, %v1685_v62  ;;  %v1822_v10 = vcombine.high %v3789_v33, %v1809_v41 }
 0x1cb   : > { %v1021_v56 = vcombine.low %v956_v55, %v972_v63  ;;  %v1197_v37 = vrot.slane %v1189_v48, %v3101_v11  ;;  %v804_v18 = vcombine.high %v3739_v59, %v796_v40  ;;  %v1680_v57 = vrot.slane %v1666_v46, %v3101_v11 }
 0x1cc   : > { %2607 = vrot.lane.b32.xlu0 %v2606_v7, %s2768_s20  ;;  %2592 = vrot.lane.b32.xlu1 %v2591_v58, %s2766_s17  ;;  %v1784_v61 = vrot.slane %v1770_v51, %v3101_v11  ;;  %v1686_v52 = vcombine.high %v1641_v5, %v1673_v17  ;;  %v1061_v31 = vrot.slane %v1053_v1, %v3101_v11  ;;  %v4411_v58 = vmov 0.0  }
 0x1cd   : > { %v1165_v54 = vrot.slane %v1157_v19, %v3101_v11  ;;  %v2611_v33 = vpack.i.bf16 %v940_v38, %v804_v18  ;;  %v1648_v32 = vrot.slane %v1634_v30, %v3101_v11  ;;  %v1190_v29 = vcombine.high %v1124_v25, %v1140_v24 }
 0x1ce   : > { %v1823_v41 = vcombine.low %v1784_v61, %v1816_v6  ;;  %v2626_v59 = vpack.i.bf16 %v1822_v10, %v1686_v52  ;;  %v1029_v40 = vrot.slane %v1021_v56, %v3101_v11  ;;  %v1857_v20 = vcombine.low %v3529_v34, %v3532_v36 }
 0x1cf   : > { %v1209_v45 = vcombine.low %v1165_v54, %v1197_v37  ;;  %v1687_v28 = vcombine.low %v1648_v32, %v1680_v57  ;;  %v1054_v17 = vcombine.high %v988_v12, %v1004_v26  ;;  %v1158_v42 = vcombine.high %v3773_v22, %v3782_v43 }
 0x1d0   : > { %2617 = vrot.lane.b32.xlu0 %v2616_v39, %s2765_s8  ;;  %2602 = vrot.lane.b32.xlu1 %v2601_v14, %s2770_s26  ;;  %v1073_v35 = vcombine.low %v1029_v40, %v1061_v31  ;;  %v1022_v60 = vcombine.high %v956_v55, %v972_v63  ;;  %v1204_v24 = vrot.slane %v1190_v29, %v3101_v11  ;;  %v2771_v1 = vmov 0  }
 0x1d1   : > { %v2636_v3 = vpack.i.bf16 %v1823_v41, %v1687_v28  ;;  %v3946_v0 = vrot.slane %v1857_v20, %v3101_v11  ;;  %v1210_v25 = vcombine.high %v1165_v54, %v1197_v37  ;;  %v1245_v34 = vcombine.low %v3598_v13, %v3601_v44  ;;  %2656 = vset.pattern.permute.xlu0 %v2771_v1 }
 0x1d2   : > { %v2621_v2 = vpack.i.bf16 %v1209_v45, %v1073_v35  ;;  %v1074_v36 = vcombine.high %v1029_v40, %v1061_v31  ;;  %v1068_v26 = vrot.slane %v1054_v17, %v3101_v11  ;;  %v1172_v22 = vrot.slane %v1158_v42, %v3101_v11 }
 0x1d3   : > { %v1036_v43 = vrot.slane %v1022_v60, %v3101_v11  ;;  %v1889_v5 = vcombine.high %v3946_v0, %v4411_v58  ;;  %v3958_v4 = vrot.slane %v1245_v34, %v3101_v11  ;;  %v1824_v12 = vcombine.high %v1784_v61, %v1816_v6 }
 0x1d4   : > { %2627 = vrot.lane.b32.xlu0 %v2626_v59, %s2769_s22  ;;  %2612 = vrot.lane.b32.xlu1 %v2611_v33, %s2770_s26  ;;  %v2631_v47 = vpack.i.bf16 %v1210_v25, %v1074_v36  ;;  %v1211_v7 = vcombine.low %v1172_v22, %v1204_v24  ;;  %v1688_v48 = vcombine.high %v1648_v32, %v1680_v57  ;;  %v4412_v25 = vld [vmem:[#allocation13_spill] sm:$0xff] }
 0x1d5   : > { %v1075_v13 = vcombine.low %v1036_v43, %v1068_v26  ;;  %v1277_v44 = vcombine.high %v3958_v4, %v4411_v58  ;;  %v1890_v11 = vcombine.high %v3568_v8, %v4411_v58  ;;  %v1212_v46 = vcombine.high %v1172_v22, %v1204_v24  ;;  %v4415_v22 = vld [vmem:[#allocation11_spill] sm:$0xff] }
 0x1d6   : > { %v2646_v15 = vpack.i.bf16 %v1824_v12, %v1688_v48  ;;  %v1076_v51 = vcombine.high %v1036_v43, %v1068_v26  ;;  %v1891_v19 = vcombine.high %v3595_v49, %v4411_v58  ;;  %v1892_v55 = vcombine.high %v3633_v21, %v4411_v58  ;;  %v2250_v49 = vld [vmem:[%s4201_s2] sm:$0xff] }
 0x1d7   : > { %v2641_v63 = vpack.i.bf16 %v1211_v7, %v1075_v13  ;;  %v1278_v8 = vcombine.high %v3636_v27, %v4411_v58  ;;  %v1279_v14 = vcombine.high %v3669_v53, %v4411_v58  ;;  %v1280_v21 = vcombine.high %v3699_v9, %v4411_v58  ;;  %v4414_v26 = vld [vmem:[#allocation10_spill] sm:$0xff] }
 0x1d8   : > { %2637 = vrot.lane.b32.xlu0 %v2636_v3, %s2766_s17  ;;  %2622 = vrot.lane.b32.xlu1 %v2621_v2, %s2765_s8  ;;  %v2651_v62 = vpack.i.bf16 %v1212_v46, %v1076_v51  ;;  %v4413_v34 = vcombine.low %v3180_v50, %v4412_v25  ;;  %v4416_v43 = vcombine.low %v4414_v26, %v4415_v22  ;;  %v4418_v46 = vld [vmem:[#allocation24_spill] sm:$0xff]  ;;  %s2343_s8 = scalar_lea.sflag [#allocation6], %s2897_s5 }
 0x1dc   : > { %2046 = vrot.lane.b32.xlu0 %v1889_v5, %s2767_s19  ;;  %2632 = vrot.lane.b32.xlu1 %v2631_v47, %s2769_s22 }
 0x1e0   : > { %1906 = vrot.lane.b32.xlu0 %v1277_v44, %s2767_s19  ;;  %2642 = vrot.lane.b32.xlu1 %v2641_v63, %s2766_s17  ;;  %s2687_s17 = scalar_lea.vmem %s4157_s23, 256  ;;  %s2691_s19 = sshll.u32 %s2772_s16, 4  ;;  %s2692_s19 = int_to_ptr.vmem [resolvable:$false] %s2691_s19 }
 0x1e1   : > { %p2688_p6 = scmp.ne.s32.totalorder %s4157_s23, %s2687_s17  ;;  %p2694_p8 = scmp.lt.s32.totalorder %s4157_s23, %s2692_s19 }
 0x1e3   : > { %p2689_p12 = pnand %p2688_p6, %p4433_p11 }
 0x1e4   : > { %2086 = vrot.lane.b32.xlu0 %v1890_v11, %s2768_s20  ;;  %2647 = vrot.lane.b32.xlu1 %v2646_v15, %s2770_s26  ;;  %v4417_v15 = vld [vmem:[#allocation23_spill] sm:$0xff] }
 0x1e5   : > { %v4419_v51 = vcombine.low %v4417_v15, %v4418_v46  ;;  %p2690_p13 = pneg %p2689_p12 }
 0x1e8   : > { %2126 = vrot.lane.b32.xlu0 %v1891_v19, %s2769_s22  ;;  %2652 = vrot.lane.b32.xlu1 %v2651_v62, %s2770_s26  ;;  %v4420_v62 = vld [vmem:[#allocation21_spill] sm:$0xff] }
 0x1ec   : > { %2166 = vrot.lane.b32.xlu0 %v1892_v55, %s2770_s26  ;;  %1946 = vrot.lane.b32.xlu1 %v1278_v8, %s2768_s20  ;;  %v4421_v55 = vld [vmem:[#allocation22_spill] sm:$0xff]  ;;  %s2693_s20 = scalar_lea.vmem %s2692_s19, 512 }
 0x1ed   : > { %v4422_v8 = vcombine.low %v4420_v62, %v4421_v55  ;;  %p2695_p10 = scmp.lt.s32.totalorder %s2693_s20, %s2687_s17 }
 0x1ef   : > { %p2696_p0 = por %p2695_p10, %p2694_p8 }
 0x1f0   : > { %1986 = vrot.lane.b32.xlu1 %v1279_v14, %s2769_s22  ;;  %2253 = vperm.xlu0 %2656, %v2250_v49  }
 0x1f1   : > { %p2697_p2 = pnand %p2696_p0, %p2690_p13 }
 0x1f4   : > { %2026 = vrot.lane.b32.xlu1 %v1280_v21, %s2770_s26 }
 0x20e   : > { %v3989_v27 = vpop.permute.xlu0 %2066 }
 0x212   : > { %v3991_v38 = vpop.permute.xlu0 %2106 }
 0x216   : > { %v3993_v30 = vpop.permute.xlu1 %1926  ;;  %v3995_v6 = vpop.permute.xlu0 %2146 }
 0x21a   : > { %v3997_v39 = vpop.permute.xlu1 %1966  ;;  %v2518_v10 = vpop.permute.xlu0 %2517 }
 0x21b   : > { %v2520_v59 = vunpack.i.h.bf16 %v2518_v10  ;;  %v2519_v40 = vunpack.i.l.bf16 %v2518_v10 }
 0x21d   : > { %v2215_v36 = vsel %vm260_vm3, %v4413_v34, %v2520_v59  ;;  %v2214_v58 = vsel %vm260_vm3, %v4416_v43, %v2519_v40 }
 0x21e   : > { %v3999_v53 = vpop.permute.xlu1 %2006  ;;  %v2528_v56 = vpop.permute.xlu0 %2527 }
 0x21f   : > { %v2530_v45 = vunpack.i.h.bf16 %v2528_v56  ;;  %v2529_v20 = vunpack.i.l.bf16 %v2528_v56 }
 0x221   : > { %v2219_v7 = vsel %vm2178_vm4, %v2214_v58, %v2529_v20  ;;  %v2220_v13 = vsel %vm2178_vm4, %v2215_v36, %v2530_v45 }
 0x222   : > { %v2538_v37 = vpop.permute.xlu0 %2537  ;;  %v2523_v18 = vpop.permute.xlu1 %2522 }
 0x223   : > { %v2540_v17 = vunpack.i.h.bf16 %v2538_v37  ;;  %v2539_v42 = vunpack.i.l.bf16 %v2538_v37  ;;  %v2525_v3 = vunpack.i.h.bf16 %v2523_v18  ;;  %v2524_v60 = vunpack.i.l.bf16 %v2523_v18 }
 0x225   : > { %v2224_v50 = vsel %vm2184_vm5, %v2219_v7, %v2539_v42  ;;  %v2225_v11 = vsel %vm2184_vm5, %v2220_v13, %v2540_v17  ;;  %v2174_v19 = vsel %vm260_vm3, %v4419_v51, %v2525_v3  ;;  %v2173_v1 = vsel %vm260_vm3, %v4422_v8, %v2524_v60 }
 0x226   : > { %v2548_v57 = vpop.permute.xlu0 %2547  ;;  %v2533_v9 = vpop.permute.xlu1 %2532 }
 0x227   : > { %v2550_v24 = vunpack.i.h.bf16 %v2548_v57  ;;  %v2549_v2 = vunpack.i.l.bf16 %v2548_v57  ;;  %v2535_v5 = vunpack.i.h.bf16 %v2533_v9  ;;  %v2534_v47 = vunpack.i.l.bf16 %v2533_v9 }
 0x229   : > { %v2229_v49 = vsel %vm2190_vm6, %v2224_v50, %v2549_v2  ;;  %v2230_v14 = vsel %vm2190_vm6, %v2225_v11, %v2550_v24  ;;  %v2179_v56 = vsel %vm2178_vm4, %v2173_v1, %v2534_v47  ;;  %v2180_v37 = vsel %vm2178_vm4, %v2174_v19, %v2535_v5 }
 0x22a   : > { %v4001_v61 = vpop.permute.xlu0 %2557  ;;  %v4003_v52 = vpop.permute.xlu1 %2542 }
 0x22b   : > { %v2545_v18 = vunpack.i.h.bf16 %v4003_v52  ;;  %v2544_v57 = vunpack.i.l.bf16 %v4003_v52  ;;  %v2560_v51 = vunpack.i.h.bf16 %v4001_v61  ;;  %v2559_v19 = vunpack.i.l.bf16 %v4001_v61 }
 0x22d   : > { %v2186_v25 = vsel %vm2184_vm5, %v2180_v37, %v2545_v18 }
 0x22e   : > { %v4005_v31 = vpop.permute.xlu0 %2567  ;;  %v4007_v54 = vpop.permute.xlu1 %2552 }
 0x22f   : > { %v2555_v9 = vunpack.i.h.bf16 %v4007_v54  ;;  %v2570_v62 = vunpack.i.h.bf16 %v4005_v31  ;;  %v2569_v55 = vunpack.i.l.bf16 %v4005_v31  ;;  %v4424_v31 = vld [vmem:[#allocation43_spill] sm:$0xff] }
 0x232   : > { %v4009_v33 = vpop.permute.xlu0 %2577  ;;  %v2563_v32 = vpop.permute.xlu1 %2562 }
 0x233   : > { %v2565_v44 = vunpack.i.h.bf16 %v2563_v32  ;;  %v2564_v63 = vunpack.i.l.bf16 %v2563_v32  ;;  %v2554_v32 = vunpack.i.l.bf16 %v4007_v54  ;;  %v2185_v54 = vsel %vm2184_vm5, %v2179_v56, %v2544_v57  ;;  %v4425_v57 = vld [vmem:[#allocation44_spill] sm:$0xff] }
 0x234   : > { %v2579_v8 = vunpack.i.l.bf16 %v4009_v33  ;;  %v2580_v1 = vunpack.i.h.bf16 %v4009_v33  ;;  %v4423_v56 = vcombine.low %v4371_v23, %v4370_v16  ;;  %v4430_v16 = vld [vmem:[#allocation68_spill] sm:$0xff] }
 0x235   : > { %v2234_v45 = vsel %vm2196_vm7, %v2229_v49, %v2564_v63  ;;  %v2235_v20 = vsel %vm2196_vm7, %v2230_v14, %v2565_v44  ;;  %v2191_v26 = vsel %vm2190_vm6, %v2185_v54, %v2554_v32  ;;  %v4427_v32 = vld [vmem:[#allocation73_spill] sm:$0xff] }
 0x236   : > { %v4011_v41 = vpop.permute.xlu0 %2587  ;;  %v4013_v29 = vpop.permute.xlu1 %2572  ;;  %v2217_v61 = vsel %vm260_vm3, %v4423_v56, %v2560_v51 }
 0x237   : > { %v2574_v17 = vunpack.i.l.bf16 %v4013_v29  ;;  %v2590_v49 = vunpack.i.h.bf16 %v4011_v41  ;;  %v2589_v14 = vunpack.i.l.bf16 %v4011_v41 }
 0x239   : > { %v2197_v5 = vsel %vm2196_vm7, %v2191_v26, %v2574_v17 }
 0x23a   : > { %v4015_v28 = vpop.permute.xlu0 %2597  ;;  %v2583_v35 = vpop.permute.xlu1 %2582 }
 0x23b   : > { %v2585_v21 = vunpack.i.h.bf16 %v2583_v35  ;;  %v2584_v10 = vunpack.i.l.bf16 %v2583_v35  ;;  %v2575_v35 = vunpack.i.h.bf16 %v4013_v29  ;;  %v2192_v29 = vsel %vm2190_vm6, %v2186_v25, %v2555_v9 }
 0x23c   : > { %v2600_v37 = vunpack.i.h.bf16 %v4015_v28  ;;  %v2599_v18 = vunpack.i.l.bf16 %v4015_v28  ;;  %v4426_v9 = vcombine.low %v4424_v31, %v4425_v57 }
 0x23d   : > { %v2239_v52 = vsel %vm2202_vm8, %v2234_v45, %v2584_v10  ;;  %v2240_v2 = vsel %vm2202_vm8, %v2235_v20, %v2585_v21  ;;  %v2198_v47 = vsel %vm2196_vm7, %v2192_v29, %v2575_v35  ;;  %v4431_v35 = vld [vmem:[#allocation69_spill] sm:$0xff] }
 0x23e   : > { %v4027_v12 = vpop.permute.xlu0 %2607  ;;  %v2593_v48 = vpop.permute.xlu1 %2592  ;;  %v2216_v33 = vsel %vm260_vm3, %v4426_v9, %v2559_v19  ;;  %v4432_v17 = vcombine.low %v4430_v16, %v4431_v35 }
 0x23f   : > { %v2595_v60 = vunpack.i.h.bf16 %v2593_v48  ;;  %v2594_v24 = vunpack.i.l.bf16 %v2593_v48  ;;  %v2610_v20 = vunpack.i.h.bf16 %v4027_v12  ;;  %v2609_v23 = vunpack.i.l.bf16 %v4027_v12 }
 0x240   : > { %v2221_v28 = vsel %vm2178_vm4, %v2216_v33, %v2579_v8 }
 0x241   : > { %v2203_v44 = vsel %vm2202_vm8, %v2197_v5, %v2594_v24  ;;  %v2204_v63 = vsel %vm2202_vm8, %v2198_v47, %v2595_v60  ;;  %v2222_v24 = vsel %vm2178_vm4, %v2217_v61, %v2580_v1 }
 0x242   : > { %v4047_v59 = vpop.permute.xlu0 %2617  ;;  %v2603_v40 = vpop.permute.xlu1 %2602 }
 0x243   : > { %v2605_v42 = vunpack.i.h.bf16 %v2603_v40  ;;  %v2604_v3 = vunpack.i.l.bf16 %v2603_v40  ;;  %v4428_v40 = vld [vmem:[#allocation74_spill] sm:$0xff]  ;;  %v2619_v60 = vunpack.i.l.bf16 %v4047_v59 }
 0x244   : > { %v4429_v45 = vcombine.low %v4427_v32, %v4428_v40 }
 0x245   : > { %v2244_v34 = vsel %vm2208_vm9, %v2239_v52, %v2604_v3  ;;  %v2245_v36 = vsel %vm2208_vm9, %v2240_v2, %v2605_v42  ;;  %v2175_v42 = vsel %vm260_vm3, %v4432_v17, %v2569_v55  ;;  %v2620_v3 = vunpack.i.h.bf16 %v4047_v59 }
 0x246   : > { %v4061_v22 = vpop.permute.xlu0 %2627  ;;  %v2613_v43 = vpop.permute.xlu1 %2612  ;;  %v2446_v58 = vpack.c.bf16 %v2245_v36, %v2244_v34  ;;  %v2176_v41 = vsel %vm260_vm3, %v4429_v45, %v2570_v62  ;;  %v2181_v52 = vsel %vm2178_vm4, %v2175_v42, %v2589_v14  ;;  %v2226_v34 = vsel %vm2184_vm5, %v2221_v28, %v2599_v18 }
 0x247   : > { %v2615_v7 = vunpack.i.h.bf16 %v2613_v43  ;;  %v2614_v13 = vunpack.i.l.bf16 %v2613_v43  ;;  %v2182_v2 = vsel %vm2178_vm4, %v2176_v41, %v2590_v49  ;;  %v2629_v54 = vunpack.i.l.bf16 %v4061_v22 }
 0x248   : > { %2447 = vmatprep.subr.bf16.mxu0 %v2446_v58  ;;  %v2227_v36 = vsel %vm2184_vm5, %v2222_v24, %v2600_v37  ;;  %v2630_v26 = vunpack.i.h.bf16 %v4061_v22  ;;  %v2187_v59 = vsel %vm2184_vm5, %v2181_v52, %v2609_v23  ;;  %v2188_v43 = vsel %vm2184_vm5, %v2182_v2, %v2610_v20  ;;  %v2249_v24 = vld [vmem:[%s4200_s1] sm:$0xff] }
 0x249   : > { %v2209_v48 = vsel %vm2208_vm9, %v2203_v44, %v2614_v13  ;;  %v2210_v50 = vsel %vm2208_vm9, %v2204_v63, %v2615_v7  ;;  %v2231_v47 = vsel %vm2190_vm6, %v2226_v34, %v2619_v60  ;;  %v2232_v7 = vsel %vm2190_vm6, %v2227_v36, %v2620_v3 }
 0x24a   : > { %v2638_v11 = vpop.permute.xlu0 %2637  ;;  %v2623_v15 = vpop.permute.xlu1 %2622  ;;  %v2448_v46 = vpack.c.bf16 %v2210_v50, %v2209_v48  ;;  %v2236_v63 = vsel %vm2196_vm7, %v2231_v47, %v2629_v54  ;;  %v2237_v51 = vsel %vm2196_vm7, %v2232_v7, %v2630_v26 }
 0x24b   : > { %v2640_v58 = vunpack.i.h.bf16 %v2638_v11  ;;  %v2639_v5 = vunpack.i.l.bf16 %v2638_v11  ;;  %v2625_v13 = vunpack.i.h.bf16 %v2623_v15  ;;  %v2624_v44 = vunpack.i.l.bf16 %v2623_v15 }
 0x24c   : > { %2449 = vmatpush1.bf16.msra.mxu0 %v2448_v46 }
 0x24d   : > { %v2241_v55 = vsel %vm2202_vm8, %v2236_v63, %v2639_v5  ;;  %v2242_v8 = vsel %vm2202_vm8, %v2237_v51, %v2640_v58  ;;  %v2194_v49 = vsel %vm2190_vm6, %v2188_v43, %v2625_v13  ;;  %v2193_v14 = vsel %vm2190_vm6, %v2187_v59, %v2624_v44 }
 0x24e   : > { %v2047_v21 = vpop.permute.xlu0 %2046  ;;  %v2633_v10 = vpop.permute.xlu1 %2632 }
 0x24f   : > { %v2218_v29 = vsel %vm260_vm3, %v3946_v0, %v2047_v21  ;;  %v2635_v48 = vunpack.i.h.bf16 %v2633_v10  ;;  %v2634_v50 = vunpack.i.l.bf16 %v2633_v10 }
 0x250   : > { %v2223_v22 = vsel %vm2178_vm4, %v2218_v29, %v3989_v27 }
 0x251   : > { %v2199_v10 = vsel %vm2196_vm7, %v2193_v14, %v2634_v50  ;;  %v2200_v56 = vsel %vm2196_vm7, %v2194_v49, %v2635_v48 }
 0x252   : > { %v1907_v12 = vpop.permute.xlu0 %1906  ;;  %v2643_v25 = vpop.permute.xlu1 %2642 }
 0x253   : > { %v2645_v15 = vunpack.i.h.bf16 %v2643_v25  ;;  %v2644_v1 = vunpack.i.l.bf16 %v2643_v25  ;;  %v2177_v57 = vsel %vm260_vm3, %v3958_v4, %v1907_v12 }
 0x254   : > { %v2183_v4 = vsel %vm2178_vm4, %v2177_v57, %v3993_v30 }
 0x255   : > { %v2205_v40 = vsel %vm2202_vm8, %v2199_v10, %v2644_v1  ;;  %v2206_v45 = vsel %vm2202_vm8, %v2200_v56, %v2645_v15 }
 0x256   : > { %v2087_v0 = vpop.permute.xlu0 %2086  ;;  %v2648_v46 = vpop.permute.xlu1 %2647 }
 0x257   : > { %v2228_v19 = vsel %vm2184_vm5, %v2223_v22, %v2087_v0  ;;  %v2650_v11 = vunpack.i.h.bf16 %v2648_v46  ;;  %v2649_v62 = vunpack.i.l.bf16 %v2648_v46 }
 0x258   : > { %v2233_v61 = vsel %vm2190_vm6, %v2228_v19, %v3991_v38 }
 0x259   : > { %v2246_v27 = vsel %vm2208_vm9, %v2241_v55, %v2649_v62  ;;  %v2247_v21 = vsel %vm2208_vm9, %v2242_v8, %v2650_v11 }
 0x25a   : > { %v2127_v37 = vpop.permute.xlu0 %2126  ;;  %v2653_v18 = vpop.permute.xlu1 %2652  ;;  %v2450_v31 = vpack.c.bf16 %v2247_v21, %v2246_v27 }
 0x25b   : > { %v2238_v9 = vsel %vm2196_vm7, %v2233_v61, %v2127_v37  ;;  %v2655_v33 = vunpack.i.h.bf16 %v2653_v18  ;;  %v2654_v32 = vunpack.i.l.bf16 %v2653_v18 }
 0x25c   : > { %2451 = vmatprep.subr.bf16.mxu0 %v2450_v31  ;;  %v2243_v38 = vsel %vm2202_vm8, %v2238_v9, %v3995_v6 }
 0x25d   : > { %v2211_v41 = vsel %vm2208_vm9, %v2205_v40, %v2654_v32  ;;  %v2212_v20 = vsel %vm2208_vm9, %v2206_v45, %v2655_v33 }
 0x25e   : > { %v2167_v23 = vpop.permute.xlu0 %2166  ;;  %v1947_v16 = vpop.permute.xlu1 %1946  ;;  %v2452_v35 = vpack.c.bf16 %v2212_v20, %v2211_v41 }
 0x25f   : > { %v2248_v17 = vsel %vm2208_vm9, %v2243_v38, %v2167_v23  ;;  %v2189_v42 = vsel %vm2184_vm5, %v2183_v4, %v1947_v16 }
 0x260   : > { %2453 = vmatpush1.bf16.msra.mxu0 %v2452_v35  ;;  %v2195_v28 = vsel %vm2190_vm6, %v2189_v42, %v3997_v39 }
 0x261   : > { %2436 = vmatprep.subr.msk.mxu0 %vm2260_vm10, %v2248_v17 }
 0x262   : > { %v1987_v3 = vpop.permute.xlu1 %1986 }
 0x263   : > { %v2201_v6 = vsel %vm2196_vm7, %v2195_v28, %v1987_v3 }
 0x264   : > { %v2207_v30 = vsel %vm2202_vm8, %v2201_v6, %v3999_v53 }
 0x266   : > { %v2027_v60 = vpop.permute.xlu1 %2026 }
 0x267   : > { %v2213_v52 = vsel %vm2208_vm9, %v2207_v30, %v2027_v60 }
 0x268   : > { %2437 = vmatpush1.msk.msra.mxu0 %vm2260_vm10, %v2213_v52 }
 0x269   : > { %2438 = vmatmul.mubr.msk.f32.vlgmr.msra.gmra.mrb[0].mxu0 %vm2256_vm11, %v2249_v24 }
 0x26f   : > { %v2254_v2 = vpop.permute.xlu0 %2253 }
 0x33c   : > { %v2333_v39 = vpop.f32.mrb[0].mxu0 }
 0x33d   : > { %v2334_v54 = vadd.f32 %v2333_v39, %v2254_v2  ;;  %v2335_v12 = vpop.f32.mrb[1].mxu0 }
 0x33e   : > { %v2336_v53 = vadd.f32 %v2335_v12, %v2254_v2 }
 0x33f   : > { %v2338_v25 = vmax.f32 %v2334_v54, 0.0 }
 0x340   : > { %v2339_v34 = vmax.f32 %v2336_v53, 0.0 }
 0x341   : > { %2340 = vst [vmem:[%s188_s11] sm:$0xff] %v2338_v25 }
 0x342   : > { %2341 = vst [vmem:[%s188_s11 + $0x8] sm:$0xff] %v2339_v34 }
 0x343   : > { %2700 = shalt.err (!%p2697_p2)
}
 0x344   : > { %s2701_s5 = scalar_lea.hbm %s4155_s7, 256  ;;  %s2705_s27 = scalar_lea.hbm %s4202_s3, 512 }
 0x345   : > { %p2702_p4 = scmp.ne.s32.totalorder %s4155_s7, %s2701_s5  ;;  %p2706_p9 = scmp.lt.u32.totalorder %s4155_s7, %s4202_s3 }
 0x346   : > { %p2707_p1 = scmp.lt.u32.totalorder %s2705_s27, %s2701_s5  ;;  %p2709_p6 = scmp.lt.u32.totalorder %s2701_s5, %s4155_s7 }
 0x347   : > { %p2703_p5 = pnand %p2702_p4, %p4433_p11 }
 0x348   : > { %p2708_p3 = por %p2707_p1, %p2706_p9 }
 0x349   : > { %p2704_p7 = pneg %p2703_p5 }
 0x34a   : > { %p2710_p12 = por %p2709_p6, %p2708_p3 }
 0x34c   : > { %p2711_p13 = pnand %p2710_p12, %p2704_p7 }
 0x34e   : > { %2714 = shalt.err (!%p2711_p13)
}
 0x34f   : > { %2456 = dma.vmem_to_hbm [thread:$0]  (%p4433_p11), %s4157_s23, 256, %s4155_s7, %s2343_s8  }
 0x350 PF: > { %s2369_s30 = sand.u32 1, %s2741_s12   ;;  %p4434_p8 = scmp.ne.s32.totalorder %s4284_s25, 0 }
 0x351   : > { %p4435_p10 = scmp.ge.s32.totalorder %s2753_s15, 2  ;;  %s2370_s9 = scalar_lea.sflag [#allocation6], %s2369_s30 }
 0x353   : > { %p2463_p0 = pnand %p4435_p10, %p4434_p8 }
 0x355   : > { %2736 = dma.done.wait (!%p2463_p0), %s2370_s9, 256  }
 0x356   : > { %2738 = vsyncadd (!%p2463_p0), %s2370_s9, 4294967040  ;;  %p16_p2 = scmp.ge.s32.totalorder %s2818_s18, 4   ;;  %s4436_s12 = smov %s2745_s13 }
 0x357   : > { %s4437_s13 = smov %s2749_s14  ;;  %s4438_s14 = smov %s2830_s21 }
 0x358   : > { %s4439_s15 = smov %s2818_s18  ;;  %18 = sbr.rel (!%p16_p2) target bundleno = 5 (0x5), region = 85 }
 0x35f   :  { %2375 = vsyncpa [#allocation5], 1 }
 0x360   :  { %2377 = vsyncpa [#allocation5 + $0x1], 1 }
 0x361   :  { %2378 = vsyncpa [#allocation6], 1 }
 0x362   :  { %2380 = vsyncpa [#allocation6 + $0x1], 1 }

</bundles_post_ra>
